<compile_context>
chip_gen: v7x
topology: tpu7x:2x2x1
jax: 0.10.0
libtpu: 0.0.40
codegen_flags: <defaults>
</compile_context>

<pallas_src>
import math

import jax
import jax.numpy as jnp
from jax.experimental import pallas as pl
from jax.experimental.pallas import tpu as pltpu

# ---------------- model config (small, deterministic) ----------------
NUM_LAYERS = 2
D_MODEL = 32
NHEAD = 4
HEAD_DIM = D_MODEL // NHEAD
FFN_DIM = 64
BATCH = 2
SEQ = 8
LN_EPS = 1e-5


def _layer_norm(x, gamma, beta, eps=LN_EPS):
    # x: (..., D); gamma/beta: (1, D)
    mean = jnp.mean(x, axis=-1, keepdims=True)
    var = jnp.mean((x - mean) ** 2, axis=-1, keepdims=True)
    return (x - mean) * jax.lax.rsqrt(var + eps) * gamma + beta


def make_encoder_kernel(num_layers, num_heads, head_dim, d_model):
    scale = 1.0 / math.sqrt(head_dim)

    def kernel(src_ref, wqkv_ref, bqkv_ref, wo_ref, bo_ref,
               w1_ref, b1_ref, w2_ref, b2_ref,
               ln1g_ref, ln1b_ref, ln2g_ref, ln2b_ref, out_ref):
        S, D = src_ref.shape          # (seq, d_model); batch dim is squeezed

        def layer_body(l, x):
            # ---- fused QKV projection (single 2-D MXU dot) ----
            qkv = jnp.dot(x, wqkv_ref[l],
                          preferred_element_type=jnp.float32) + bqkv_ref[l]
            q = qkv[:, :D] * scale               # fold 1/sqrt(hd) into q once
            k = qkv[:, D:2 * D]
            v = qkv[:, 2 * D:]

            # ---- batched multi-head attention (no per-head slices/concat) ----
            qh = q.reshape(S, num_heads, head_dim)
            kh = k.reshape(S, num_heads, head_dim)
            vh = v.reshape(S, num_heads, head_dim)
            s = jnp.einsum('qhd,khd->hqk', qh, kh,
                           preferred_element_type=jnp.float32)
            s = s - jnp.max(s, axis=-1, keepdims=True)
            p = jnp.exp(s)
            p = p * pl.reciprocal(jnp.sum(p, axis=-1, keepdims=True),
                                  approx=True)
            ctx = jnp.einsum('hqk,khd->qhd', p, vh,
                             preferred_element_type=jnp.float32)
            ctx = ctx.reshape(S, D)

            attn = jnp.dot(ctx, wo_ref[l],
                           preferred_element_type=jnp.float32) + bo_ref[l]
            x = _layer_norm(x + attn, ln1g_ref[l], ln1b_ref[l])

            # ---- feed-forward ----
            h1 = jnp.dot(x, w1_ref[l],
                         preferred_element_type=jnp.float32) + b1_ref[l]
            h1 = jnp.maximum(h1, 0.0)            # relu
            ffn = jnp.dot(h1, w2_ref[l],
                          preferred_element_type=jnp.float32) + b2_ref[l]
            x = _layer_norm(x + ffn, ln2g_ref[l], ln2b_ref[l])
            return x

        x0 = src_ref[...]
        out_ref[...] = jax.lax.fori_loop(0, num_layers, layer_body, x0,
                                         unroll=True)

    return kernel


def transformer_encoder(src, params, *, num_heads=NHEAD):
    B, S, D = src.shape
    L = params['wqkv'].shape[0]
    F = params['w1'].shape[-1]

    def wspec(d0, d1):
        # Full-L weight block, resident for every grid step (constant index map).
        return pl.BlockSpec((L, d0, d1), lambda b: (0, 0, 0))

    in_specs = [
        pl.BlockSpec((None, S, D), lambda b: (b, 0, 0)),   # src (batch squeezed)
        wspec(D, 3 * D), wspec(1, 3 * D),                  # qkv proj
        wspec(D, D), wspec(1, D),                          # out proj
        wspec(D, F), wspec(1, F),                          # ffn linear1
        wspec(F, D), wspec(1, D),                          # ffn linear2
        wspec(1, D), wspec(1, D),                          # layernorm1
        wspec(1, D), wspec(1, D),                          # layernorm2
    ]

    kernel = make_encoder_kernel(L, num_heads, D // num_heads, D)

    return pl.pallas_call(
        kernel,
        out_shape=jax.ShapeDtypeStruct((B, S, D), src.dtype),
        grid_spec=pltpu.PrefetchScalarGridSpec(
            num_scalar_prefetch=0,
            grid=(B,),                                     # parallel over batch
            in_specs=in_specs,
            out_specs=pl.BlockSpec((None, S, D), lambda b: (b, 0, 0)),
        ),
        # Write the result back into the (donated) src buffer.
        input_output_aliases={0: 0},
        compiler_params=pltpu.CompilerParams(
            dimension_semantics=("parallel",)),
    )(src, params['wqkv'], params['bqkv'], params['wo'], params['bo'],
      params['w1'], params['b1'], params['w2'], params['b2'],
      params['ln1g'], params['ln1b'], params['ln2g'], params['ln2b'])


# ---------------- pure-JAX reference (for correctness check) ----------------
def reference_encoder(src, p, num_heads=NHEAD):
    x = src
    L, D = p['wqkv'].shape[0], src.shape[-1]
    hd = D // num_heads
    for l in range(L):
        qkv = x @ p['wqkv'][l] + p['bqkv'][l]
        q, k, v = qkv[..., :D], qkv[..., D:2 * D], qkv[..., 2 * D:]
        ctx = []
        for h in range(num_heads):
            sl = slice(h * hd, (h + 1) * hd)
            s = jnp.einsum('bqe,bke->bqk', q[..., sl], k[..., sl]) / math.sqrt(hd)
            a = jax.nn.softmax(s, axis=-1)
            ctx.append(jnp.einsum('bqk,bke->bqe', a, v[..., sl]))
        ctx = jnp.concatenate(ctx, axis=-1)
        x = _layer_norm(x + ctx @ p['wo'][l] + p['bo'][l],
                        p['ln1g'][l], p['ln1b'][l])
        h1 = jnp.maximum(x @ p['w1'][l] + p['b1'][l], 0.0)
        x = _layer_norm(x + h1 @ p['w2'][l] + p['b2'][l],
                        p['ln2g'][l], p['ln2b'][l])
    return x


def init_params(key, L=NUM_LAYERS, D=D_MODEL, F=FFN_DIM):
    ks = jax.random.split(key, 12)
    n = lambda k, shape, s: (jax.random.normal(k, shape, jnp.float32) * s)
    return {
        'wqkv': n(ks[0], (L, D, 3 * D), 0.05),
        'bqkv': n(ks[1], (L, 1, 3 * D), 0.01),
        'wo':   n(ks[2], (L, D, D), 0.05),
        'bo':   n(ks[3], (L, 1, D), 0.01),
        'w1':   n(ks[4], (L, D, F), 0.05),
        'b1':   n(ks[5], (L, 1, F), 0.01),
        'w2':   n(ks[6], (L, F, D), 0.05),
        'b2':   n(ks[7], (L, 1, D), 0.01),
        'ln1g': 1.0 + n(ks[8], (L, 1, D), 0.01),
        'ln1b': n(ks[9], (L, 1, D), 0.01),
        'ln2g': 1.0 + n(ks[10], (L, 1, D), 0.01),
        'ln2b': n(ks[11], (L, 1, D), 0.01),
    }


if __name__ == "__main__":
    key = jax.random.PRNGKey(0)
    k_src, k_par = jax.random.split(key)
    src = jax.random.normal(k_src, (BATCH, SEQ, D_MODEL), jnp.float32)
    params = init_params(k_par)

    # Reference first (src buffer is donated to the kernel output via aliasing).
    ref = reference_encoder(src, params)
    ref = jax.block_until_ready(ref)

    encoder = jax.jit(transformer_encoder, donate_argnums=(0,))
    out = encoder(src, params)
    out = jax.block_until_ready(out)

    assert out.shape == (BATCH, SEQ, D_MODEL)
    err = jnp.max(jnp.abs(out - ref))
    # slightly relaxed tolerance: softmax denom uses the EUP approx reciprocal
    assert jnp.allclose(out, ref, rtol=1e-3, atol=1e-3), f"max abs err {err}"

    print("KERNEL_OK")
</pallas_src>

<mosaic_0001>
module attributes {stable_mosaic.version = 11 : i64} {
  func.func @kernel(%arg0: i32, %arg1: memref<1x8x32xf32, #tpu.memory_space<vmem>>, %arg2: memref<2x32x96xf32, #tpu.memory_space<vmem>>, %arg3: memref<2x1x96xf32, #tpu.memory_space<vmem>>, %arg4: memref<2x32x32xf32, #tpu.memory_space<vmem>>, %arg5: memref<2x1x32xf32, #tpu.memory_space<vmem>>, %arg6: memref<2x32x64xf32, #tpu.memory_space<vmem>>, %arg7: memref<2x1x64xf32, #tpu.memory_space<vmem>>, %arg8: memref<2x64x32xf32, #tpu.memory_space<vmem>>, %arg9: memref<2x1x32xf32, #tpu.memory_space<vmem>>, %arg10: memref<2x1x32xf32, #tpu.memory_space<vmem>>, %arg11: memref<2x1x32xf32, #tpu.memory_space<vmem>>, %arg12: memref<2x1x32xf32, #tpu.memory_space<vmem>>, %arg13: memref<2x1x32xf32, #tpu.memory_space<vmem>>, %arg14: memref<1x8x32xf32, #tpu.memory_space<vmem>>) attributes {dimension_semantics = [#tpu.dimension_semantics<parallel>], iteration_bounds = array<i64: 2>, scalar_prefetch = 0 : i64, scratch_operands = 0 : i64, tpu.core_type = #tpu.core_type<tc>, window_params = [{transform_indices = @transform_0, window_bounds = array<i64: 1, 8, 32>}, {pipeline_mode = #tpu.pipeline_mode<synchronous>, transform_indices = @transform_1, window_bounds = array<i64: 2, 32, 96>}, {pipeline_mode = #tpu.pipeline_mode<synchronous>, transform_indices = @transform_2, window_bounds = array<i64: 2, 1, 96>}, {pipeline_mode = #tpu.pipeline_mode<synchronous>, transform_indices = @transform_3, window_bounds = array<i64: 2, 32, 32>}, {pipeline_mode = #tpu.pipeline_mode<synchronous>, transform_indices = @transform_4, window_bounds = array<i64: 2, 1, 32>}, {pipeline_mode = #tpu.pipeline_mode<synchronous>, transform_indices = @transform_5, window_bounds = array<i64: 2, 32, 64>}, {pipeline_mode = #tpu.pipeline_mode<synchronous>, transform_indices = @transform_6, window_bounds = array<i64: 2, 1, 64>}, {pipeline_mode = #tpu.pipeline_mode<synchronous>, transform_indices = @transform_7, window_bounds = array<i64: 2, 64, 32>}, {pipeline_mode = #tpu.pipeline_mode<synchronous>, transform_indices = @transform_8, window_bounds = array<i64: 2, 1, 32>}, {pipeline_mode = #tpu.pipeline_mode<synchronous>, transform_indices = @transform_9, window_bounds = array<i64: 2, 1, 32>}, {pipeline_mode = #tpu.pipeline_mode<synchronous>, transform_indices = @transform_10, window_bounds = array<i64: 2, 1, 32>}, {pipeline_mode = #tpu.pipeline_mode<synchronous>, transform_indices = @transform_11, window_bounds = array<i64: 2, 1, 32>}, {pipeline_mode = #tpu.pipeline_mode<synchronous>, transform_indices = @transform_12, window_bounds = array<i64: 2, 1, 32>}, {transform_indices = @transform_13, window_bounds = array<i64: 1, 8, 32>}]} {
    %c0 = arith.constant 0 : index
    %c0_0 = arith.constant 0 : index
    %c0_1 = arith.constant 0 : index
    %0 = vector.load %arg1[%c0, %c0_0, %c0_1] : memref<1x8x32xf32, #tpu.memory_space<vmem>>, vector<1x8x32xf32>
    %1 = vector.shape_cast %0 : vector<1x8x32xf32> to vector<8x32xf32>
    %c0_i32 = arith.constant 0 : i32
    %2 = arith.index_cast %c0_i32 : i32 to index
    %c0_2 = arith.constant 0 : index
    %c0_3 = arith.constant 0 : index
    %3 = vector.load %arg2[%2, %c0_2, %c0_3] : memref<2x32x96xf32, #tpu.memory_space<vmem>>, vector<1x32x96xf32>
    %4 = vector.shape_cast %3 : vector<1x32x96xf32> to vector<32x96xf32>
    %cst = arith.constant dense<0.000000e+00> : vector<8x96xf32>
    %5 = tpu.matmul %1, %4, %cst {dimension_numbers = #tpu.dot_dimension_numbers<[1], [0], [0], [1], [0, 0, 1, 1], [], []>} : vector<8x32xf32>, vector<32x96xf32>, vector<8x96xf32> -> vector<8x96xf32>
    %6 = arith.index_cast %c0_i32 : i32 to index
    %c0_4 = arith.constant 0 : index
    %c0_5 = arith.constant 0 : index
    %7 = vector.load %arg3[%6, %c0_4, %c0_5] : memref<2x1x96xf32, #tpu.memory_space<vmem>>, vector<1x1x96xf32>
    %8 = vector.shape_cast %7 : vector<1x1x96xf32> to vector<1x96xf32>
    %9 = vector.broadcast %8 : vector<1x96xf32> to vector<8x96xf32>
    %10 = arith.addf %5, %9 : vector<8x96xf32>
    %11 = vector.extract_strided_slice %10 {offsets = [0, 0], sizes = [8, 32], strides = [1, 1]} : vector<8x96xf32> to vector<8x32xf32>
    %cst_6 = arith.constant 0.353553385 : f32
    %12 = vector.broadcast %cst_6 : f32 to vector<8x32xf32>
    %13 = arith.mulf %11, %12 : vector<8x32xf32>
    %14 = vector.extract_strided_slice %10 {offsets = [0, 32], sizes = [8, 32], strides = [1, 1]} : vector<8x96xf32> to vector<8x32xf32>
    %15 = vector.extract_strided_slice %10 {offsets = [0, 64], sizes = [8, 32], strides = [1, 1]} : vector<8x96xf32> to vector<8x32xf32>
    %16 = vector.shape_cast %13 : vector<8x32xf32> to vector<8x4x8xf32>
    %17 = vector.shape_cast %14 : vector<8x32xf32> to vector<8x4x8xf32>
    %18 = vector.shape_cast %15 : vector<8x32xf32> to vector<8x4x8xf32>
    "tpu.trace_start"() <{level = 10 : i32, message = "qhd,khd->hqk"}> : () -> ()
    %cst_7 = arith.constant dense<0.000000e+00> : vector<4x8x8xf32>
    %19 = tpu.matmul %16, %17, %cst_7 {dimension_numbers = #tpu.dot_dimension_numbers<[2], [2], [0], [0], [0, 1, 0, 0, 1, 0], [1], [1]>} : vector<8x4x8xf32>, vector<8x4x8xf32>, vector<4x8x8xf32> -> vector<4x8x8xf32>
    "tpu.trace_stop"() : () -> ()
    %cst_8 = arith.constant dense<0xFF800000> : vector<4x8xf32>
    %20 = vector.multi_reduction <maximumf>, %19, %cst_8 [2] : vector<4x8x8xf32> to vector<4x8xf32>
    %21 = vector.shape_cast %20 : vector<4x8xf32> to vector<4x8x1xf32>
    %22 = vector.broadcast %21 : vector<4x8x1xf32> to vector<4x8x8xf32>
    %23 = arith.subf %19, %22 : vector<4x8x8xf32>
    %24 = math.exp %23 : vector<4x8x8xf32>
    %cst_9 = arith.constant dense<0.000000e+00> : vector<4x8xf32>
    %25 = vector.multi_reduction <add>, %24, %cst_9 [2] : vector<4x8x8xf32> to vector<4x8xf32>
    %26 = vector.shape_cast %25 : vector<4x8xf32> to vector<4x8x1xf32>
    %27 = tpu.reciprocal %26 {approx = true} : vector<4x8x1xf32> -> vector<4x8x1xf32>
    %28 = vector.broadcast %27 : vector<4x8x1xf32> to vector<4x8x8xf32>
    %29 = arith.mulf %24, %28 : vector<4x8x8xf32>
    "tpu.trace_start"() <{level = 10 : i32, message = "hqk,khd->qhd"}> : () -> ()
    %cst_10 = arith.constant dense<0.000000e+00> : vector<4x8x8xf32>
    %30 = tpu.matmul %18, %29, %cst_10 {dimension_numbers = #tpu.dot_dimension_numbers<[0], [2], [2], [1], [0, 1, 0, 2, 1, 1], [1], [0]>} : vector<8x4x8xf32>, vector<4x8x8xf32>, vector<4x8x8xf32> -> vector<4x8x8xf32>
    %31 = tpu.transpose %30, [2, 0, 1] : vector<4x8x8xf32> -> vector<8x4x8xf32>
    "tpu.trace_stop"() : () -> ()
    %32 = vector.shape_cast %31 : vector<8x4x8xf32> to vector<8x32xf32>
    %33 = arith.index_cast %c0_i32 : i32 to index
    %c0_11 = arith.constant 0 : index
    %c0_12 = arith.constant 0 : index
    %34 = vector.load %arg4[%33, %c0_11, %c0_12] : memref<2x32x32xf32, #tpu.memory_space<vmem>>, vector<1x32x32xf32>
    %35 = vector.shape_cast %34 : vector<1x32x32xf32> to vector<32x32xf32>
    %cst_13 = arith.constant dense<0.000000e+00> : vector<8x32xf32>
    %36 = tpu.matmul %32, %35, %cst_13 {dimension_numbers = #tpu.dot_dimension_numbers<[1], [0], [0], [1], [0, 0, 1, 1], [], []>} : vector<8x32xf32>, vector<32x32xf32>, vector<8x32xf32> -> vector<8x32xf32>
    %37 = arith.index_cast %c0_i32 : i32 to index
    %c0_14 = arith.constant 0 : index
    %c0_15 = arith.constant 0 : index
    %38 = vector.load %arg5[%37, %c0_14, %c0_15] : memref<2x1x32xf32, #tpu.memory_space<vmem>>, vector<1x1x32xf32>
    %39 = vector.shape_cast %38 : vector<1x1x32xf32> to vector<1x32xf32>
    %40 = vector.broadcast %39 : vector<1x32xf32> to vector<8x32xf32>
    %41 = arith.addf %36, %40 : vector<8x32xf32>
    %42 = arith.addf %1, %41 : vector<8x32xf32>
    %43 = arith.index_cast %c0_i32 : i32 to index
    %c0_16 = arith.constant 0 : index
    %c0_17 = arith.constant 0 : index
    %44 = vector.load %arg10[%43, %c0_16, %c0_17] : memref<2x1x32xf32, #tpu.memory_space<vmem>>, vector<1x1x32xf32>
    %45 = vector.shape_cast %44 : vector<1x1x32xf32> to vector<1x32xf32>
    %46 = arith.index_cast %c0_i32 : i32 to index
    %c0_18 = arith.constant 0 : index
    %c0_19 = arith.constant 0 : index
    %47 = vector.load %arg11[%46, %c0_18, %c0_19] : memref<2x1x32xf32, #tpu.memory_space<vmem>>, vector<1x1x32xf32>
    %48 = vector.shape_cast %47 : vector<1x1x32xf32> to vector<1x32xf32>
    %cst_20 = arith.constant dense<0.000000e+00> : vector<8xf32>
    %49 = vector.multi_reduction <add>, %42, %cst_20 [1] : vector<8x32xf32> to vector<8xf32>
    %50 = vector.shape_cast %49 : vector<8xf32> to vector<8x1xf32>
    %cst_21 = arith.constant 3.200000e+01 : f32
    %51 = vector.broadcast %cst_21 : f32 to vector<8x1xf32>
    %52 = arith.divf %50, %51 : vector<8x1xf32>
    %53 = vector.broadcast %52 : vector<8x1xf32> to vector<8x32xf32>
    %54 = arith.subf %42, %53 : vector<8x32xf32>
    %55 = arith.mulf %54, %54 : vector<8x32xf32>
    %cst_22 = arith.constant dense<0.000000e+00> : vector<8xf32>
    %56 = vector.multi_reduction <add>, %55, %cst_22 [1] : vector<8x32xf32> to vector<8xf32>
    %57 = vector.shape_cast %56 : vector<8xf32> to vector<8x1xf32>
    %cst_23 = arith.constant 3.200000e+01 : f32
    %58 = vector.broadcast %cst_23 : f32 to vector<8x1xf32>
    %59 = arith.divf %57, %58 : vector<8x1xf32>
    %60 = vector.broadcast %52 : vector<8x1xf32> to vector<8x32xf32>
    %61 = arith.subf %42, %60 : vector<8x32xf32>
    %cst_24 = arith.constant 9.99999974E-6 : f32
    %62 = vector.broadcast %cst_24 : f32 to vector<8x1xf32>
    %63 = arith.addf %59, %62 : vector<8x1xf32>
    %64 = math.rsqrt %63 : vector<8x1xf32>
    %65 = vector.broadcast %64 : vector<8x1xf32> to vector<8x32xf32>
    %66 = arith.mulf %61, %65 : vector<8x32xf32>
    %67 = vector.broadcast %45 : vector<1x32xf32> to vector<8x32xf32>
    %68 = arith.mulf %66, %67 : vector<8x32xf32>
    %69 = vector.broadcast %48 : vector<1x32xf32> to vector<8x32xf32>
    %70 = arith.addf %68, %69 : vector<8x32xf32>
    %71 = arith.index_cast %c0_i32 : i32 to index
    %c0_25 = arith.constant 0 : index
    %c0_26 = arith.constant 0 : index
    %72 = vector.load %arg6[%71, %c0_25, %c0_26] : memref<2x32x64xf32, #tpu.memory_space<vmem>>, vector<1x32x64xf32>
    %73 = vector.shape_cast %72 : vector<1x32x64xf32> to vector<32x64xf32>
    %cst_27 = arith.constant dense<0.000000e+00> : vector<8x64xf32>
    %74 = tpu.matmul %70, %73, %cst_27 {dimension_numbers = #tpu.dot_dimension_numbers<[1], [0], [0], [1], [0, 0, 1, 1], [], []>} : vector<8x32xf32>, vector<32x64xf32>, vector<8x64xf32> -> vector<8x64xf32>
    %75 = arith.index_cast %c0_i32 : i32 to index
    %c0_28 = arith.constant 0 : index
    %c0_29 = arith.constant 0 : index
    %76 = vector.load %arg7[%75, %c0_28, %c0_29] : memref<2x1x64xf32, #tpu.memory_space<vmem>>, vector<1x1x64xf32>
    %77 = vector.shape_cast %76 : vector<1x1x64xf32> to vector<1x64xf32>
    %78 = vector.broadcast %77 : vector<1x64xf32> to vector<8x64xf32>
    %79 = arith.addf %74, %78 : vector<8x64xf32>
    %cst_30 = arith.constant 0.000000e+00 : f32
    %80 = vector.broadcast %cst_30 : f32 to vector<8x64xf32>
    %81 = arith.maximumf %79, %80 : vector<8x64xf32>
    %82 = arith.index_cast %c0_i32 : i32 to index
    %c0_31 = arith.constant 0 : index
    %c0_32 = arith.constant 0 : index
    %83 = vector.load %arg8[%82, %c0_31, %c0_32] : memref<2x64x32xf32, #tpu.memory_space<vmem>>, vector<1x64x32xf32>
    %84 = vector.shape_cast %83 : vector<1x64x32xf32> to vector<64x32xf32>
    %cst_33 = arith.constant dense<0.000000e+00> : vector<8x32xf32>
    %85 = tpu.matmul %81, %84, %cst_33 {dimension_numbers = #tpu.dot_dimension_numbers<[1], [0], [0], [1], [0, 0, 1, 1], [], []>} : vector<8x64xf32>, vector<64x32xf32>, vector<8x32xf32> -> vector<8x32xf32>
    %86 = arith.index_cast %c0_i32 : i32 to index
    %c0_34 = arith.constant 0 : index
    %c0_35 = arith.constant 0 : index
    %87 = vector.load %arg9[%86, %c0_34, %c0_35] : memref<2x1x32xf32, #tpu.memory_space<vmem>>, vector<1x1x32xf32>
    %88 = vector.shape_cast %87 : vector<1x1x32xf32> to vector<1x32xf32>
    %89 = vector.broadcast %88 : vector<1x32xf32> to vector<8x32xf32>
    %90 = arith.addf %85, %89 : vector<8x32xf32>
    %91 = arith.addf %70, %90 : vector<8x32xf32>
    %92 = arith.index_cast %c0_i32 : i32 to index
    %c0_36 = arith.constant 0 : index
    %c0_37 = arith.constant 0 : index
    %93 = vector.load %arg12[%92, %c0_36, %c0_37] : memref<2x1x32xf32, #tpu.memory_space<vmem>>, vector<1x1x32xf32>
    %94 = vector.shape_cast %93 : vector<1x1x32xf32> to vector<1x32xf32>
    %95 = arith.index_cast %c0_i32 : i32 to index
    %c0_38 = arith.constant 0 : index
    %c0_39 = arith.constant 0 : index
    %96 = vector.load %arg13[%95, %c0_38, %c0_39] : memref<2x1x32xf32, #tpu.memory_space<vmem>>, vector<1x1x32xf32>
    %97 = vector.shape_cast %96 : vector<1x1x32xf32> to vector<1x32xf32>
    %cst_40 = arith.constant dense<0.000000e+00> : vector<8xf32>
    %98 = vector.multi_reduction <add>, %91, %cst_40 [1] : vector<8x32xf32> to vector<8xf32>
    %99 = vector.shape_cast %98 : vector<8xf32> to vector<8x1xf32>
    %cst_41 = arith.constant 3.200000e+01 : f32
    %100 = vector.broadcast %cst_41 : f32 to vector<8x1xf32>
    %101 = arith.divf %99, %100 : vector<8x1xf32>
    %102 = vector.broadcast %101 : vector<8x1xf32> to vector<8x32xf32>
    %103 = arith.subf %91, %102 : vector<8x32xf32>
    %104 = arith.mulf %103, %103 : vector<8x32xf32>
    %cst_42 = arith.constant dense<0.000000e+00> : vector<8xf32>
    %105 = vector.multi_reduction <add>, %104, %cst_42 [1] : vector<8x32xf32> to vector<8xf32>
    %106 = vector.shape_cast %105 : vector<8xf32> to vector<8x1xf32>
    %cst_43 = arith.constant 3.200000e+01 : f32
    %107 = vector.broadcast %cst_43 : f32 to vector<8x1xf32>
    %108 = arith.divf %106, %107 : vector<8x1xf32>
    %109 = vector.broadcast %101 : vector<8x1xf32> to vector<8x32xf32>
    %110 = arith.subf %91, %109 : vector<8x32xf32>
    %cst_44 = arith.constant 9.99999974E-6 : f32
    %111 = vector.broadcast %cst_44 : f32 to vector<8x1xf32>
    %112 = arith.addf %108, %111 : vector<8x1xf32>
    %113 = math.rsqrt %112 : vector<8x1xf32>
    %114 = vector.broadcast %113 : vector<8x1xf32> to vector<8x32xf32>
    %115 = arith.mulf %110, %114 : vector<8x32xf32>
    %116 = vector.broadcast %94 : vector<1x32xf32> to vector<8x32xf32>
    %117 = arith.mulf %115, %116 : vector<8x32xf32>
    %118 = vector.broadcast %97 : vector<1x32xf32> to vector<8x32xf32>
    %119 = arith.addf %117, %118 : vector<8x32xf32>
    %c1_i32 = arith.constant 1 : i32
    %120 = arith.index_cast %c1_i32 : i32 to index
    %c0_45 = arith.constant 0 : index
    %c0_46 = arith.constant 0 : index
    %121 = vector.load %arg2[%120, %c0_45, %c0_46] : memref<2x32x96xf32, #tpu.memory_space<vmem>>, vector<1x32x96xf32>
    %122 = vector.shape_cast %121 : vector<1x32x96xf32> to vector<32x96xf32>
    %cst_47 = arith.constant dense<0.000000e+00> : vector<8x96xf32>
    %123 = tpu.matmul %119, %122, %cst_47 {dimension_numbers = #tpu.dot_dimension_numbers<[1], [0], [0], [1], [0, 0, 1, 1], [], []>} : vector<8x32xf32>, vector<32x96xf32>, vector<8x96xf32> -> vector<8x96xf32>
    %124 = arith.index_cast %c1_i32 : i32 to index
    %c0_48 = arith.constant 0 : index
    %c0_49 = arith.constant 0 : index
    %125 = vector.load %arg3[%124, %c0_48, %c0_49] : memref<2x1x96xf32, #tpu.memory_space<vmem>>, vector<1x1x96xf32>
    %126 = vector.shape_cast %125 : vector<1x1x96xf32> to vector<1x96xf32>
    %127 = vector.broadcast %126 : vector<1x96xf32> to vector<8x96xf32>
    %128 = arith.addf %123, %127 : vector<8x96xf32>
    %129 = vector.extract_strided_slice %128 {offsets = [0, 0], sizes = [8, 32], strides = [1, 1]} : vector<8x96xf32> to vector<8x32xf32>
    %cst_50 = arith.constant 0.353553385 : f32
    %130 = vector.broadcast %cst_50 : f32 to vector<8x32xf32>
    %131 = arith.mulf %129, %130 : vector<8x32xf32>
    %132 = vector.extract_strided_slice %128 {offsets = [0, 32], sizes = [8, 32], strides = [1, 1]} : vector<8x96xf32> to vector<8x32xf32>
    %133 = vector.extract_strided_slice %128 {offsets = [0, 64], sizes = [8, 32], strides = [1, 1]} : vector<8x96xf32> to vector<8x32xf32>
    %134 = vector.shape_cast %131 : vector<8x32xf32> to vector<8x4x8xf32>
    %135 = vector.shape_cast %132 : vector<8x32xf32> to vector<8x4x8xf32>
    %136 = vector.shape_cast %133 : vector<8x32xf32> to vector<8x4x8xf32>
    "tpu.trace_start"() <{level = 10 : i32, message = "qhd,khd->hqk"}> : () -> ()
    %cst_51 = arith.constant dense<0.000000e+00> : vector<4x8x8xf32>
    %137 = tpu.matmul %134, %135, %cst_51 {dimension_numbers = #tpu.dot_dimension_numbers<[2], [2], [0], [0], [0, 1, 0, 0, 1, 0], [1], [1]>} : vector<8x4x8xf32>, vector<8x4x8xf32>, vector<4x8x8xf32> -> vector<4x8x8xf32>
    "tpu.trace_stop"() : () -> ()
    %cst_52 = arith.constant dense<0xFF800000> : vector<4x8xf32>
    %138 = vector.multi_reduction <maximumf>, %137, %cst_52 [2] : vector<4x8x8xf32> to vector<4x8xf32>
    %139 = vector.shape_cast %138 : vector<4x8xf32> to vector<4x8x1xf32>
    %140 = vector.broadcast %139 : vector<4x8x1xf32> to vector<4x8x8xf32>
    %141 = arith.subf %137, %140 : vector<4x8x8xf32>
    %142 = math.exp %141 : vector<4x8x8xf32>
    %cst_53 = arith.constant dense<0.000000e+00> : vector<4x8xf32>
    %143 = vector.multi_reduction <add>, %142, %cst_53 [2] : vector<4x8x8xf32> to vector<4x8xf32>
    %144 = vector.shape_cast %143 : vector<4x8xf32> to vector<4x8x1xf32>
    %145 = tpu.reciprocal %144 {approx = true} : vector<4x8x1xf32> -> vector<4x8x1xf32>
    %146 = vector.broadcast %145 : vector<4x8x1xf32> to vector<4x8x8xf32>
    %147 = arith.mulf %142, %146 : vector<4x8x8xf32>
    "tpu.trace_start"() <{level = 10 : i32, message = "hqk,khd->qhd"}> : () -> ()
    %cst_54 = arith.constant dense<0.000000e+00> : vector<4x8x8xf32>
    %148 = tpu.matmul %136, %147, %cst_54 {dimension_numbers = #tpu.dot_dimension_numbers<[0], [2], [2], [1], [0, 1, 0, 2, 1, 1], [1], [0]>} : vector<8x4x8xf32>, vector<4x8x8xf32>, vector<4x8x8xf32> -> vector<4x8x8xf32>
    %149 = tpu.transpose %148, [2, 0, 1] : vector<4x8x8xf32> -> vector<8x4x8xf32>
    "tpu.trace_stop"() : () -> ()
    %150 = vector.shape_cast %149 : vector<8x4x8xf32> to vector<8x32xf32>
    %151 = arith.index_cast %c1_i32 : i32 to index
    %c0_55 = arith.constant 0 : index
    %c0_56 = arith.constant 0 : index
    %152 = vector.load %arg4[%151, %c0_55, %c0_56] : memref<2x32x32xf32, #tpu.memory_space<vmem>>, vector<1x32x32xf32>
    %153 = vector.shape_cast %152 : vector<1x32x32xf32> to vector<32x32xf32>
    %cst_57 = arith.constant dense<0.000000e+00> : vector<8x32xf32>
    %154 = tpu.matmul %150, %153, %cst_57 {dimension_numbers = #tpu.dot_dimension_numbers<[1], [0], [0], [1], [0, 0, 1, 1], [], []>} : vector<8x32xf32>, vector<32x32xf32>, vector<8x32xf32> -> vector<8x32xf32>
    %155 = arith.index_cast %c1_i32 : i32 to index
    %c0_58 = arith.constant 0 : index
    %c0_59 = arith.constant 0 : index
    %156 = vector.load %arg5[%155, %c0_58, %c0_59] : memref<2x1x32xf32, #tpu.memory_space<vmem>>, vector<1x1x32xf32>
    %157 = vector.shape_cast %156 : vector<1x1x32xf32> to vector<1x32xf32>
    %158 = vector.broadcast %157 : vector<1x32xf32> to vector<8x32xf32>
    %159 = arith.addf %154, %158 : vector<8x32xf32>
    %160 = arith.addf %119, %159 : vector<8x32xf32>
    %161 = arith.index_cast %c1_i32 : i32 to index
    %c0_60 = arith.constant 0 : index
    %c0_61 = arith.constant 0 : index
    %162 = vector.load %arg10[%161, %c0_60, %c0_61] : memref<2x1x32xf32, #tpu.memory_space<vmem>>, vector<1x1x32xf32>
    %163 = vector.shape_cast %162 : vector<1x1x32xf32> to vector<1x32xf32>
    %164 = arith.index_cast %c1_i32 : i32 to index
    %c0_62 = arith.constant 0 : index
    %c0_63 = arith.constant 0 : index
    %165 = vector.load %arg11[%164, %c0_62, %c0_63] : memref<2x1x32xf32, #tpu.memory_space<vmem>>, vector<1x1x32xf32>
    %166 = vector.shape_cast %165 : vector<1x1x32xf32> to vector<1x32xf32>
    %cst_64 = arith.constant dense<0.000000e+00> : vector<8xf32>
    %167 = vector.multi_reduction <add>, %160, %cst_64 [1] : vector<8x32xf32> to vector<8xf32>
    %168 = vector.shape_cast %167 : vector<8xf32> to vector<8x1xf32>
    %cst_65 = arith.constant 3.200000e+01 : f32
    %169 = vector.broadcast %cst_65 : f32 to vector<8x1xf32>
    %170 = arith.divf %168, %169 : vector<8x1xf32>
    %171 = vector.broadcast %170 : vector<8x1xf32> to vector<8x32xf32>
    %172 = arith.subf %160, %171 : vector<8x32xf32>
    %173 = arith.mulf %172, %172 : vector<8x32xf32>
    %cst_66 = arith.constant dense<0.000000e+00> : vector<8xf32>
    %174 = vector.multi_reduction <add>, %173, %cst_66 [1] : vector<8x32xf32> to vector<8xf32>
    %175 = vector.shape_cast %174 : vector<8xf32> to vector<8x1xf32>
    %cst_67 = arith.constant 3.200000e+01 : f32
    %176 = vector.broadcast %cst_67 : f32 to vector<8x1xf32>
    %177 = arith.divf %175, %176 : vector<8x1xf32>
    %178 = vector.broadcast %170 : vector<8x1xf32> to vector<8x32xf32>
    %179 = arith.subf %160, %178 : vector<8x32xf32>
    %cst_68 = arith.constant 9.99999974E-6 : f32
    %180 = vector.broadcast %cst_68 : f32 to vector<8x1xf32>
    %181 = arith.addf %177, %180 : vector<8x1xf32>
    %182 = math.rsqrt %181 : vector<8x1xf32>
    %183 = vector.broadcast %182 : vector<8x1xf32> to vector<8x32xf32>
    %184 = arith.mulf %179, %183 : vector<8x32xf32>
    %185 = vector.broadcast %163 : vector<1x32xf32> to vector<8x32xf32>
    %186 = arith.mulf %184, %185 : vector<8x32xf32>
    %187 = vector.broadcast %166 : vector<1x32xf32> to vector<8x32xf32>
    %188 = arith.addf %186, %187 : vector<8x32xf32>
    %189 = arith.index_cast %c1_i32 : i32 to index
    %c0_69 = arith.constant 0 : index
    %c0_70 = arith.constant 0 : index
    %190 = vector.load %arg6[%189, %c0_69, %c0_70] : memref<2x32x64xf32, #tpu.memory_space<vmem>>, vector<1x32x64xf32>
    %191 = vector.shape_cast %190 : vector<1x32x64xf32> to vector<32x64xf32>
    %cst_71 = arith.constant dense<0.000000e+00> : vector<8x64xf32>
    %192 = tpu.matmul %188, %191, %cst_71 {dimension_numbers = #tpu.dot_dimension_numbers<[1], [0], [0], [1], [0, 0, 1, 1], [], []>} : vector<8x32xf32>, vector<32x64xf32>, vector<8x64xf32> -> vector<8x64xf32>
    %193 = arith.index_cast %c1_i32 : i32 to index
    %c0_72 = arith.constant 0 : index
    %c0_73 = arith.constant 0 : index
    %194 = vector.load %arg7[%193, %c0_72, %c0_73] : memref<2x1x64xf32, #tpu.memory_space<vmem>>, vector<1x1x64xf32>
    %195 = vector.shape_cast %194 : vector<1x1x64xf32> to vector<1x64xf32>
    %196 = vector.broadcast %195 : vector<1x64xf32> to vector<8x64xf32>
    %197 = arith.addf %192, %196 : vector<8x64xf32>
    %cst_74 = arith.constant 0.000000e+00 : f32
    %198 = vector.broadcast %cst_74 : f32 to vector<8x64xf32>
    %199 = arith.maximumf %197, %198 : vector<8x64xf32>
    %200 = arith.index_cast %c1_i32 : i32 to index
    %c0_75 = arith.constant 0 : index
    %c0_76 = arith.constant 0 : index
    %201 = vector.load %arg8[%200, %c0_75, %c0_76] : memref<2x64x32xf32, #tpu.memory_space<vmem>>, vector<1x64x32xf32>
    %202 = vector.shape_cast %201 : vector<1x64x32xf32> to vector<64x32xf32>
    %cst_77 = arith.constant dense<0.000000e+00> : vector<8x32xf32>
    %203 = tpu.matmul %199, %202, %cst_77 {dimension_numbers = #tpu.dot_dimension_numbers<[1], [0], [0], [1], [0, 0, 1, 1], [], []>} : vector<8x64xf32>, vector<64x32xf32>, vector<8x32xf32> -> vector<8x32xf32>
    %204 = arith.index_cast %c1_i32 : i32 to index
    %c0_78 = arith.constant 0 : index
    %c0_79 = arith.constant 0 : index
    %205 = vector.load %arg9[%204, %c0_78, %c0_79] : memref<2x1x32xf32, #tpu.memory_space<vmem>>, vector<1x1x32xf32>
    %206 = vector.shape_cast %205 : vector<1x1x32xf32> to vector<1x32xf32>
    %207 = vector.broadcast %206 : vector<1x32xf32> to vector<8x32xf32>
    %208 = arith.addf %203, %207 : vector<8x32xf32>
    %209 = arith.addf %188, %208 : vector<8x32xf32>
    %210 = arith.index_cast %c1_i32 : i32 to index
    %c0_80 = arith.constant 0 : index
    %c0_81 = arith.constant 0 : index
    %211 = vector.load %arg12[%210, %c0_80, %c0_81] : memref<2x1x32xf32, #tpu.memory_space<vmem>>, vector<1x1x32xf32>
    %212 = vector.shape_cast %211 : vector<1x1x32xf32> to vector<1x32xf32>
    %213 = arith.index_cast %c1_i32 : i32 to index
    %c0_82 = arith.constant 0 : index
    %c0_83 = arith.constant 0 : index
    %214 = vector.load %arg13[%213, %c0_82, %c0_83] : memref<2x1x32xf32, #tpu.memory_space<vmem>>, vector<1x1x32xf32>
    %215 = vector.shape_cast %214 : vector<1x1x32xf32> to vector<1x32xf32>
    %cst_84 = arith.constant dense<0.000000e+00> : vector<8xf32>
    %216 = vector.multi_reduction <add>, %209, %cst_84 [1] : vector<8x32xf32> to vector<8xf32>
    %217 = vector.shape_cast %216 : vector<8xf32> to vector<8x1xf32>
    %cst_85 = arith.constant 3.200000e+01 : f32
    %218 = vector.broadcast %cst_85 : f32 to vector<8x1xf32>
    %219 = arith.divf %217, %218 : vector<8x1xf32>
    %220 = vector.broadcast %219 : vector<8x1xf32> to vector<8x32xf32>
    %221 = arith.subf %209, %220 : vector<8x32xf32>
    %222 = arith.mulf %221, %221 : vector<8x32xf32>
    %cst_86 = arith.constant dense<0.000000e+00> : vector<8xf32>
    %223 = vector.multi_reduction <add>, %222, %cst_86 [1] : vector<8x32xf32> to vector<8xf32>
    %224 = vector.shape_cast %223 : vector<8xf32> to vector<8x1xf32>
    %cst_87 = arith.constant 3.200000e+01 : f32
    %225 = vector.broadcast %cst_87 : f32 to vector<8x1xf32>
    %226 = arith.divf %224, %225 : vector<8x1xf32>
    %227 = vector.broadcast %219 : vector<8x1xf32> to vector<8x32xf32>
    %228 = arith.subf %209, %227 : vector<8x32xf32>
    %cst_88 = arith.constant 9.99999974E-6 : f32
    %229 = vector.broadcast %cst_88 : f32 to vector<8x1xf32>
    %230 = arith.addf %226, %229 : vector<8x1xf32>
    %231 = math.rsqrt %230 : vector<8x1xf32>
    %232 = vector.broadcast %231 : vector<8x1xf32> to vector<8x32xf32>
    %233 = arith.mulf %228, %232 : vector<8x32xf32>
    %234 = vector.broadcast %212 : vector<1x32xf32> to vector<8x32xf32>
    %235 = arith.mulf %233, %234 : vector<8x32xf32>
    %236 = vector.broadcast %215 : vector<1x32xf32> to vector<8x32xf32>
    %237 = arith.addf %235, %236 : vector<8x32xf32>
    %c2_i32 = arith.constant 2 : i32
    %c0_89 = arith.constant 0 : index
    %c0_90 = arith.constant 0 : index
    %c0_91 = arith.constant 0 : index
    %238 = vector.load %arg14[%c0_89, %c0_90, %c0_91] : memref<1x8x32xf32, #tpu.memory_space<vmem>>, vector<1x8x32xf32>
    %239 = vector.shape_cast %238 : vector<1x8x32xf32> to vector<8x32xf32>
    %240 = vector.shape_cast %237 : vector<8x32xf32> to vector<1x8x32xf32>
    tpu.vector_store %arg14[%c0_89, %c0_90, %c0_91], %240 {strides = array<i32>} : memref<1x8x32xf32, #tpu.memory_space<vmem>>, vector<1x8x32xf32>,
    return
  }
  func.func @transform_0(%arg0: i32) -> (i32, i32, i32) {
    %c0_i32 = arith.constant 0 : i32
    %c0_i32_0 = arith.constant 0 : i32
    %c0_i32_1 = arith.constant 0 : i32
    return %arg0, %c0_i32, %c0_i32_0 : i32, i32, i32
  }
  func.func @transform_1(%arg0: i32) -> (i32, i32, i32) {
    %c0_i32 = arith.constant 0 : i32
    %c0_i32_0 = arith.constant 0 : i32
    %c0_i32_1 = arith.constant 0 : i32
    %c0_i32_2 = arith.constant 0 : i32
    return %c0_i32, %c0_i32_0, %c0_i32_1 : i32, i32, i32
  }
  func.func @transform_2(%arg0: i32) -> (i32, i32, i32) {
    %c0_i32 = arith.constant 0 : i32
    %c0_i32_0 = arith.constant 0 : i32
    %c0_i32_1 = arith.constant 0 : i32
    %c0_i32_2 = arith.constant 0 : i32
    return %c0_i32, %c0_i32_0, %c0_i32_1 : i32, i32, i32
  }
  func.func @transform_3(%arg0: i32) -> (i32, i32, i32) {
    %c0_i32 = arith.constant 0 : i32
    %c0_i32_0 = arith.constant 0 : i32
    %c0_i32_1 = arith.constant 0 : i32
    %c0_i32_2 = arith.constant 0 : i32
    return %c0_i32, %c0_i32_0, %c0_i32_1 : i32, i32, i32
  }
  func.func @transform_4(%arg0: i32) -> (i32, i32, i32) {
    %c0_i32 = arith.constant 0 : i32
    %c0_i32_0 = arith.constant 0 : i32
    %c0_i32_1 = arith.constant 0 : i32
    %c0_i32_2 = arith.constant 0 : i32
    return %c0_i32, %c0_i32_0, %c0_i32_1 : i32, i32, i32
  }
  func.func @transform_5(%arg0: i32) -> (i32, i32, i32) {
    %c0_i32 = arith.constant 0 : i32
    %c0_i32_0 = arith.constant 0 : i32
    %c0_i32_1 = arith.constant 0 : i32
    %c0_i32_2 = arith.constant 0 : i32
    return %c0_i32, %c0_i32_0, %c0_i32_1 : i32, i32, i32
  }
  func.func @transform_6(%arg0: i32) -> (i32, i32, i32) {
    %c0_i32 = arith.constant 0 : i32
    %c0_i32_0 = arith.constant 0 : i32
    %c0_i32_1 = arith.constant 0 : i32
    %c0_i32_2 = arith.constant 0 : i32
    return %c0_i32, %c0_i32_0, %c0_i32_1 : i32, i32, i32
  }
  func.func @transform_7(%arg0: i32) -> (i32, i32, i32) {
    %c0_i32 = arith.constant 0 : i32
    %c0_i32_0 = arith.constant 0 : i32
    %c0_i32_1 = arith.constant 0 : i32
    %c0_i32_2 = arith.constant 0 : i32
    return %c0_i32, %c0_i32_0, %c0_i32_1 : i32, i32, i32
  }
  func.func @transform_8(%arg0: i32) -> (i32, i32, i32) {
    %c0_i32 = arith.constant 0 : i32
    %c0_i32_0 = arith.constant 0 : i32
    %c0_i32_1 = arith.constant 0 : i32
    %c0_i32_2 = arith.constant 0 : i32
    return %c0_i32, %c0_i32_0, %c0_i32_1 : i32, i32, i32
  }
  func.func @transform_9(%arg0: i32) -> (i32, i32, i32) {
    %c0_i32 = arith.constant 0 : i32
    %c0_i32_0 = arith.constant 0 : i32
    %c0_i32_1 = arith.constant 0 : i32
    %c0_i32_2 = arith.constant 0 : i32
    return %c0_i32, %c0_i32_0, %c0_i32_1 : i32, i32, i32
  }
  func.func @transform_10(%arg0: i32) -> (i32, i32, i32) {
    %c0_i32 = arith.constant 0 : i32
    %c0_i32_0 = arith.constant 0 : i32
    %c0_i32_1 = arith.constant 0 : i32
    %c0_i32_2 = arith.constant 0 : i32
    return %c0_i32, %c0_i32_0, %c0_i32_1 : i32, i32, i32
  }
  func.func @transform_11(%arg0: i32) -> (i32, i32, i32) {
    %c0_i32 = arith.constant 0 : i32
    %c0_i32_0 = arith.constant 0 : i32
    %c0_i32_1 = arith.constant 0 : i32
    %c0_i32_2 = arith.constant 0 : i32
    return %c0_i32, %c0_i32_0, %c0_i32_1 : i32, i32, i32
  }
  func.func @transform_12(%arg0: i32) -> (i32, i32, i32) {
    %c0_i32 = arith.constant 0 : i32
    %c0_i32_0 = arith.constant 0 : i32
    %c0_i32_1 = arith.constant 0 : i32
    %c0_i32_2 = arith.constant 0 : i32
    return %c0_i32, %c0_i32_0, %c0_i32_1 : i32, i32, i32
  }
  func.func @transform_13(%arg0: i32) -> (i32, i32, i32) {
    %c0_i32 = arith.constant 0 : i32
    %c0_i32_0 = arith.constant 0 : i32
    %c0_i32_1 = arith.constant 0 : i32
    return %arg0, %c0_i32, %c0_i32_0 : i32, i32, i32
  }
}

</mosaic_0001>

<bundles_post_ra>
// kernel: transformer_encoder.1
= control target key start
LH: loop header
LB: loop body
LE: loop exit
PB: predicated region body
PF: predicated region fallthrough
CT: control target
= control target key end

     0   :  { %s5149_s0 = inlined_call_operand.hbm [shape: f32[2,8,32], index: 0, kind: input, shape index: {}, may-alias: {0,13}]   ;;  %s5150_s1 = inlined_call_operand.vmem [shape: f32[2,32,96], index: 1, kind: input, shape index: {}]   ;;  %s5151_s2 = inlined_call_operand.vmem [shape: f32[2,1,96], index: 2, kind: input, shape index: {}]   ;;  %s5152_s3 = inlined_call_operand.vmem [shape: f32[2,32,32], index: 3, kind: input, shape index: {}]   ;;  %s5153_s4 = inlined_call_operand.vmem [shape: f32[2,1,32], index: 4, kind: input, shape index: {}]   ;;  %s5154_s5 = inlined_call_operand.vmem [shape: f32[2,32,64], index: 5, kind: input, shape index: {}]   ;;  %s5155_s6 = inlined_call_operand.hbm [shape: f32[2,1,64], index: 6, kind: input, shape index: {}]   ;;  %s5156_s7 = inlined_call_operand.vmem [shape: f32[2,64,32], index: 7, kind: input, shape index: {}]   ;;  %s5157_s8 = inlined_call_operand.vmem [shape: f32[2,1,32], index: 8, kind: input, shape index: {}]   ;;  %s5158_s9 = inlined_call_operand.vmem [shape: f32[2,1,32], index: 9, kind: input, shape index: {}]   ;;  %s5159_s10 = inlined_call_operand.vmem [shape: f32[2,1,32], index: 10, kind: input, shape index: {}]   ;;  %s5160_s11 = inlined_call_operand.vmem [shape: f32[2,1,32], index: 11, kind: input, shape index: {}]   ;;  %s5161_s12 = inlined_call_operand.vmem [shape: f32[2,1,32], index: 12, kind: input, shape index: {}]   ;;  %s5162_s13 = inlined_call_operand.hbm [shape: f32[2,8,32], index: 13, kind: output, shape index: {}, may-alias: {0,13}]  }
   0x1   :  { %5179 = sst [smem:[#allocation14_spill]] %s5149_s0 }
   0x2   :  { %5180 = sst [smem:[#allocation15_spill]] %s5160_s11 }
   0x3   :  { %5181 = sst [smem:[#allocation16_spill]] %s5161_s12 }
   0x4   :  { %5182 = sst [smem:[#allocation17_spill]] %s5162_s13 }
   0x5   :  { %18 = vsyncpa [#allocation3], 0 }
   0x6   :  { %20 = vsyncpa [#allocation3 + $0x1], 0 }
   0x7   :  { %21 = vsyncpa [#allocation6], 0 }
   0x8   :  { %22 = vsyncpa [#allocation4], 0 }
   0x9   :  { %24 = vsyncpa [#allocation4 + $0x1], 0  ;;  %s4554_s25 = smov 0   ;;  %s4556_s26 = smov 0  }
   0xa   :  { %s4558_s27 = smov 0   ;;  %s4560_s28 = smov 0  }
   0xb LB: > { %5183 = sst [smem:[#allocation11_spill]] %s4452_s25  ;;  %s4575_s29 = sadd.s32 4294967295, %s4464_s28   ;;  %s4464_s28 = sphi %s4560_s28, %s5211_s28   ;;  %s4460_s27 = sphi %s4558_s27, %s5214_s27   ;;  %s4456_s26 = sphi %s4556_s26, %s5213_s26   ;;  %s4452_s25 = sphi %s4554_s25, %s5212_s25  }
   0xc   : > { %s3807_s30 = sadd.s32 4294967294, %s4464_s28   ;;  %p50_p0 = scmp.ne.s32.totalorder %s4456_s26, %s4452_s25 }
   0xd   : > { %p5168_p1 = scmp.eq.s32.totalorder %s4575_s29, 0  ;;  %p332_p3 = scmp.eq.s32.totalorder %s3807_s30, 1 }
   0xe   : > { %p3808_p5 = scmp.ge.s32.totalorder %s4464_s28, 1  ;;  %p339_p7 = scmp.lt.s32.totalorder %s4464_s28, 3 }
   0xf   : > { %p4584_p4 = por %p5168_p1, %p50_p0  ;;  %p4589_p6 = por %p332_p3, %p50_p0 }
  0x10   : > { %p4594_p8 = pnand %p3808_p5, %p339_p7  ;;  %s4466_s17 = smov [#allocation5]  }
  0x11   : > { %s5184_s14 = scalar_select %p4584_p4, 1, 0 }
  0x12   : > { %s5185_s15 = scalar_select %p4589_p6, 1, 0 }
  0x13   : > { %s5187_s16 = scalar_select %p4594_p8, 1, 0 }
  0x14   : > { %5186 = sst [smem:[#allocation12_spill]] %s5185_s15  ;;  %s366_s18 = sshll.u32 %s4466_s17, 4  ;;  %s4598_s18 = int_to_ptr.vmem [resolvable:$true] %s366_s18 }
  0x15   : > { %p4232_p9 = pneg %p4594_p8  ;;  %s4610_s20 = sadd.s32 1, %s4464_s28  }
  0x16   : > { %5189 = sst [smem:[#allocation13_spill]] %s4610_s20  ;;  %s37_s21 = sadd.s32 1, %s4460_s27 }
  0x17   : > { %p4605_p11 = pnand %p4232_p9, %p5168_p1  ;;  %s34_s22 = ssub.s32 %s4464_s28, %s4610_s20 }
  0x18   : > { %s4336_s30 = scalar_lea.hbm %s5155_s6, 32 }
  0x19   : > { %p4337_p12 = scmp.ne.s32.totalorder %s5155_s6, %s4336_s30  ;;  %p4338_p13 = pneg %p4605_p11 }
  0x1a   : > { %p4343_p5 = scmp.lt.u32.totalorder %s4336_s30, %s5155_s6 }
  0x1b   : > { %p4339_p0 = pnand %p4338_p13, %p4337_p12 }
  0x1d   : > { %p4340_p3 = pneg %p4339_p0 }
  0x1f   : > { %p4345_p7 = pnand %p4343_p5, %p4340_p3 }
  0x21   : > { %4348 = shalt.err (!%p4345_p7)
}
  0x22   : > { %s4349_s20 = scalar_lea.vmem %s4598_s18, 32  ;;  %p4357_p2 = scmp.lt.s32.totalorder %s4598_s18, %s4598_s18 }
  0x23   : > { %p4350_p9 = scmp.ne.s32.totalorder %s4598_s18, %s4349_s20  ;;  %p4358_p6 = scmp.lt.s32.totalorder %s4349_s20, %s4349_s20 }
  0x25   : > { %p4352_p10 = pnand %p4350_p9, %p4338_p13  ;;  %p4359_p4 = por %p4358_p6, %p4357_p2 }
  0x27   : > { %p4353_p1 = pneg %p4352_p10 }
  0x29   : > { %p4360_p8 = pnand %p4359_p4, %p4353_p1 }
  0x2b   : > { %4363 = shalt.err (!%p4360_p8)
}
  0x2c   : > { %s4467_s15 = smov 16   ;;  %s4468_s13 = smov 1  }
  0x2d   : > { %4235 = dma.hbm_to_vmem [thread:$0]  (!%p4605_p11), %s5155_s6, 32, %s4598_s18, [#allocation6], %s4467_s15, %s4467_s15, %s4468_s13  }
  0x2e   : > { %p35_p2 = scmp.eq.s32.totalorder %s34_s22, 0  ;;  %p44_p1 = scmp.ne.s32.totalorder %s4460_s27, %s4456_s26 }
  0x2f   : > { %p45_p4 = scmp.eq.s32.totalorder %s4464_s28, 0  ;;  %p4245_p6 = scmp.lt.s32.totalorder %s4464_s28, 2 }
  0x30   : > { %s4641_s20 = scalar_select %p35_p2, %s4460_s27, %s37_s21  }
  0x31   : > { %p46_p8 = por %p45_p4, %p44_p1  ;;  %p5190_p10 = scmp.eq.s32.totalorder %s4575_s29, 1 }
  0x32   : > { %s398_s30 = sand.u32 1, %s4460_s27   ;;  %s3812_s17 = sshll.u32 %s4464_s28, 7 }
  0x33   : > { %p4645_p12 = por %p5190_p10, %p44_p1  ;;  %s3811_s12 = sshll.u32 %s398_s30, 3 }
  0x34   : > { %s5192_s0 = sld [smem:[#allocation14_spill]]  ;;  %s402_s18 = scalar_lea.vmem [#allocation2], %s3811_s12 }
  0x35   : > { %s409_s21 = sshll.u32 %s402_s18, 4  ;;  %p4656_p11 = pnand %p4245_p6, %p46_p8  ;;  %s4660_s21 = int_to_ptr.vmem [resolvable:$true] %s409_s21 }
  0x36   : > { %s399_s15 = scalar_lea.sflag [#allocation3], %s398_s30 }
  0x37   : > { %p4366_p0 = pneg %p4656_p11 }
  0x3a   : > { %s4654_s25 = scalar_lea.hbm %s5192_s0, %s3812_s17  ;;  %s4369_s23 = scalar_lea.hbm %s5192_s0, 256 }
  0x3b   : > { %s4364_s13 = scalar_lea.hbm %s4654_s25, 128  ;;  %p4370_p7 = scmp.lt.u32.totalorder %s4654_s25, %s5192_s0 }
  0x3c   : > { %p4365_p13 = scmp.ne.s32.totalorder %s4654_s25, %s4364_s13  ;;  %p4371_p9 = scmp.lt.u32.totalorder %s4369_s23, %s4364_s13 }
  0x3d   : > { %p4373_p1 = scmp.lt.u32.totalorder %s4364_s13, %s4654_s25 }
  0x3e   : > { %p4367_p3 = pnand %p4366_p0, %p4365_p13  ;;  %p4372_p2 = por %p4371_p9, %p4370_p7 }
  0x40   : > { %p4368_p5 = pneg %p4367_p3  ;;  %p4374_p4 = por %p4373_p1, %p4372_p2 }
  0x42   : > { %p4375_p6 = pnand %p4374_p4, %p4368_p5 }
  0x44   : > { %4378 = shalt.err (!%p4375_p6)
}
  0x45   : > { %s4379_s30 = scalar_lea.vmem %s4660_s21, 128  ;;  %s4469_s18 = smov [#allocation2]  }
  0x46   : > { %p4380_p8 = scmp.ne.s32.totalorder %s4660_s21, %s4379_s30  ;;  %s4384_s11 = sshll.u32 %s4469_s18, 4  ;;  %s4385_s11 = int_to_ptr.vmem [resolvable:$false] %s4384_s11 }
  0x47   : > { %s4386_s12 = scalar_lea.vmem %s4385_s11, 256  ;;  %p4387_p3 = scmp.lt.s32.totalorder %s4660_s21, %s4385_s11 }
  0x48   : > { %p4382_p10 = pnand %p4380_p8, %p4366_p0  ;;  %p4388_p7 = scmp.lt.s32.totalorder %s4386_s12, %s4379_s30 }
  0x4a   : > { %p4383_p13 = pneg %p4382_p10  ;;  %p4389_p9 = por %p4388_p7, %p4387_p3 }
  0x4c   : > { %p4390_p2 = pnand %p4389_p9, %p4383_p13 }
  0x4e   : > { %4393 = shalt.err (!%p4390_p2)
}
  0x4f   : > { %4239 = dma.hbm_to_vmem [thread:$0]  (!%p4656_p11), %s4654_s25, 128, %s4660_s21, %s399_s15  }
  0x50   : > { %p5194_p5 = scmp.ne.s32.totalorder %s5187_s16, 0 }
  0x51   : > { %s4690_s13 = sand.u32 (!%p5194_p5), 1, %s4456_s26   ;;  %p5195_p0 = scmp.ne.s32.totalorder (!%p5194_p5), %s5184_s14, 0 }
  0x52   : > { %418 = sbr.rel (%p5194_p5) target bundleno = 5891 (0x1703), region = 72  ;;  %s5173_s23 = sshll.u32 (!%p5194_p5), %s4690_s13, 3 }
  0x53   : > { %s421_s17 = scalar_lea.sflag (!%p5194_p5), [#allocation3], %s4690_s13  ;;  %s424_s19 = scalar_lea.vmem (!%p5194_p5), [#allocation2], %s5173_s23 }
  0x59   : > { %4439 = dma.done.wait (%p5195_p0), %s421_s17, 128  }
  0x5a   : > { %4441 = vsyncadd (%p5195_p0), %s421_s17, 4294967168  ;;  %p5196_p11 = scmp.eq.s32.totalorder %s4575_s29, 0 }
  0x5c   : > { %4443 = dma.done.wait (%p5196_p11), [#allocation6], 32   ;;  %p5197_p1 = pmov %p5196_p11 }
  0x5d   : > { %v4470_v0 = vmov 0.0|0.0   ;;  %vm4471_vm0 = vmmov 0   ;;  %v4472_v1 = vmov 0.0   ;;  %v472_v2 = vld [vmem:[%s5150_s1] sm:$0xff]  ;;  %v473_v3 = vld [vmem:[%s5150_s1 + $0x8] sm:$0xff]  ;;  %v474_v4 = vld [vmem:[%s5150_s1 + $0x10] sm:$0xff] }
  0x5e   : > { %4445 = vsyncadd (%p5197_p1), [#allocation6], 4294967264  ;;  %4164 = vmatprep.subr.bf16.mxu0 %v4470_v0  ;;  %3988 = vmatprep.mubr.msk.f32.mxu0 %vm4471_vm0, %v4472_v1  ;;  %v4165_v5 = vpack.c.bf16 %v473_v3, %v472_v2  ;;  %v475_v6 = vld [vmem:[%s5150_s1 + $0x18] sm:$0xff]  ;;  %v4723_v8 = vld [vmem:[%s424_s19] sm:$0xff]  ;;  %vm483_vm1 = vcmask 261120   ;;  %s4473_s17 = smov 104  }
  0x5f   : > { %3991 = vmatprep.subr.mxu1 %v4472_v1  ;;  %3993 = vmatprep.mubr.msk.f32.mxu1 %vm4471_vm0, %v4472_v1  ;;  %v4168_v7 = vpack.c.bf16 %v475_v6, %v474_v4  ;;  %v3817_v9 = vld [vmem:[%s5151_s2] ss:$0 sm:$0xff]  ;;  %s4474_s19 = smov 120   ;;  %s4475_s14 = smov 96   ;;  %vm712_vm2 = vcmask 64512   ;;  %vm1766_vm3 = vcmask 130048  }
  0x60   : > { %4166 = vmatpush3.bf16.msra.mxu0 %v4165_v5  ;;  %s4476_s16 = smov 112   ;;  %s5177_s25 = smov 64   ;;  %vm1768_vm4 = vcmask 195584   ;;  %vm1985_vm5 = vcmask 523264  }
  0x61   : > { %4167 = vmatprep.subr.bf16.mxu0 %v4470_v0  ;;  %s5176_s22 = smov 16   ;;  %s5175_s15 = smov 8  }
  0x62   : > { %s5174_s30 = smov 24   ;;  %s5200_s12 = sld [smem:[#allocation16_spill]] }
  0x63   : > { %s5202_s21 = smov 16   ;;  %s5203_s18 = smov 8  }
  0x64   : > { %4169 = vmatpush3.bf16.msra.mxu0 %v4168_v7  ;;  %s3897_s11 = sshll.u32 %s4575_s29, 7  ;;  %s5205_s23 = sshll.u32 %s4690_s13, 3 }
  0x65   : > { %4006 = vmatprep.subr.mxu0 %v4472_v1  ;;  %s4483_s29 = smov [#allocation7]  }
  0x67   : > { %3989 = vmatmul.mubr.msk.f32.vlgmr.msra.gmra.mrb[0].mxu0 %vm483_vm1, %v4723_v8 }
  0x68   : > { %4008 = vmatprep.mubr.msk.f32.mxu0 %vm4471_vm0, %v4472_v1 }
 0x13a   : > { %v553_v10 = vpop.f32.mrb[0].mxu0 }
 0x13b   : > { %v4733_v11 = vadd.f32 %v3817_v9, %v553_v10  ;;  %v3990_v12 = vpop.f32.mrb[1].mxu0 }
 0x13d   : > { %570 = vrot.lane.b32.xlu1 %v4733_v11, %s4473_s17  ;;  %566 = vrot.lane.b32.xlu0 %v4733_v11, %s4474_s19  ;;  %v557_v16 = vmul.f32 0.35355338, %v4733_v11 }
 0x141   : > { %572 = vrot.lane.b32.xlu1 %v4733_v11, %s4475_s14  ;;  %568 = vrot.lane.b32.xlu0 %v4733_v11, %s4476_s16 }
 0x1af   : > { %v567_v13 = vpop.permute.xlu0 %566  ;;  %v571_v14 = vpop.permute.xlu1 %570 }
 0x1b0   : > { %574 = vrot.lane.b32.xlu0 %v567_v13, %s4475_s14 }
 0x1b3   : > { %v569_v15 = vpop.permute.xlu0 %568  ;;  %v573_v17 = vpop.permute.xlu1 %572 }
 0x1b4   : > { %578 = vrot.lane.b32.xlu0 %v571_v14, %s4475_s14  ;;  %576 = vrot.lane.b32.xlu1 %v569_v15, %s4475_s14 }
 0x1b8   : > { %561 = vrot.lane.b32.xlu0 %v557_v16, %s4476_s16  ;;  %559 = vrot.lane.b32.xlu1 %v557_v16, %s4474_s19 }
 0x1bc   : > { %563 = vrot.lane.b32.xlu1 %v557_v16, %s4473_s17 }
 0x1d6   : > { %584 = vxpose.xlu0.b32.start.end [1/1] (short) (narrow) %v573_v17, 8 }
 0x222   : > { %v575_v18 = vpop.permute.xlu0 %574 }
 0x223   : > { %616 = vxpose.xlu1.b32.start.end [1/1] (short) (narrow) %v575_v18, 8 }
 0x226   : > { %v577_v19 = vpop.permute.xlu1 %576  ;;  %v579_v20 = vpop.permute.xlu0 %578 }
 0x227   : > { %648 = vxpose.xlu0.b32.start.end [1/1] (short) (narrow) %v577_v19, 8 }
 0x22a   : > { %v562_v21 = vpop.permute.xlu0 %561  ;;  %v560_v23 = vpop.permute.xlu1 %559 }
 0x22b   : > { %680 = vxpose.xlu0.b32.start.end [1/1] (short) (narrow) %v579_v20, 8 }
 0x22e   : > { %v564_v24 = vpop.permute.xlu1 %563 }
 0x256   : > { %v600_v22 = vpop.trf.xlu0 }
 0x257   : > { %3992 = vmatpush3.msra.mxu1 %v600_v22 }
 0x258   : > { %3994 = vmatmul.mubr.msk.f32.vlgmr.msra.gmra.mrb[0].mxu1 %vm712_vm2, %v557_v16  ;;  %3996 = vmatprep.subr.mxu1 %v4472_v1 }
 0x259   : > { %3998 = vmatprep.mubr.msk.f32.mxu1 %vm4471_vm0, %v4472_v1 }
 0x2a3   : > { %v632_v25 = vpop.trf.xlu1 }
 0x2a4   : > { %3997 = vmatpush3.msra.mxu1 %v632_v25 }
 0x2a5   : > { %3999 = vmatmul.mubr.msk.f32.vlgmr.msra.gmra.mrb[2].mxu1 %vm712_vm2, %v560_v23  ;;  %4001 = vmatprep.subr.mxu1 %v4472_v1 }
 0x2a6   : > { %4003 = vmatprep.mubr.msk.f32.mxu1 %vm4471_vm0, %v4472_v1 }
 0x2a7   : > { %v664_v26 = vpop.trf.xlu0 }
 0x2a8   : > { %4002 = vmatpush3.msra.mxu1 %v664_v26 }
 0x2a9   : > { %4004 = vmatmul.mubr.msk.f32.vlgmr.msra.gmra.mrb[4].mxu1 %vm712_vm2, %v562_v21  ;;  %4011 = vmatprep.subr.mxu1 %v4472_v1 }
 0x2aa   : > { %4013 = vmatprep.mubr.msk.f32.mxu1 %vm4471_vm0, %v4472_v1 }
 0x2ab   : > { %v696_v27 = vpop.trf.xlu0 }
 0x2ac   : > { %4007 = vmatpush3.msra.mxu0 %v696_v27  ;;  %v1770_v27 = vld [vmem:[%s5152_s3] sm:$0xff] }
 0x2ad   : > { %4009 = vmatmul.mubr.msk.f32.vlgmr.msra.gmra.mrb[2].mxu0 %vm712_vm2, %v564_v24  ;;  %4016 = vmatprep.subr.mxu0 %v4472_v1 }
 0x2ae   : > { %4018 = vmatprep.mubr.msk.f32.mxu0 %vm4471_vm0, %v4472_v1 }
 0x32b   : > { %v781_v28 = vpop.f32.mrb[0].mxu1 }
 0x32c   : > { %v3995_v29 = vpop.f32.mrb[1].mxu1  ;;  %v1001_v30 = vsel %vm712_vm2, %v781_v28, -inf }
 0x32d   : > { %1002 = vmax.xlane.f32.xlu0 %v1001_v30  ;;  %v4478_v30 = vmov 1983009808  }
 0x378   : > { %v853_v31 = vpop.f32.mrb[2].mxu1 }
 0x379   : > { %v4000_v32 = vpop.f32.mrb[3].mxu1  ;;  %v1004_v33 = vsel %vm712_vm2, %v853_v31, -inf }
 0x37a   : > { %1005 = vmax.xlane.f32.xlu1 %v1004_v33  ;;  %v1622_v32 = vlaneseq }
 0x37c   : > { %v925_v34 = vpop.f32.mrb[4].mxu1 }
 0x37d   : > { %v4005_v35 = vpop.f32.mrb[5].mxu1  ;;  %v1007_v36 = vsel %vm712_vm2, %v925_v34, -inf }
 0x37e   : > { %1008 = vmax.xlane.f32.xlu1 %v1007_v36 }
 0x380   : > { %v997_v37 = vpop.f32.mrb[2].mxu0 }
 0x381   : > { %v4010_v38 = vpop.f32.mrb[3].mxu0  ;;  %v1010_v39 = vsel %vm712_vm2, %v997_v37, -inf }
 0x382   : > { %1011 = vmax.xlane.f32.xlu0 %v1010_v39 }
 0x38f   : > { %1045 = vrot.lane.b32.xlu1 %v4733_v11, %s5177_s25 }
 0x393   : > { %1049 = vrot.lane.b32.xlu1 %v569_v15, %s5177_s25 }
 0x397   : > { %1051 = vrot.lane.b32.xlu1 %v571_v14, %s5177_s25 }
 0x398   : > { %1047 = vrot.lane.b32.xlu0 %v567_v13, %s5177_s25  ;;  %s5198_s25 = sld [smem:[#allocation15_spill]] }
 0x3ba   : > { %v1003_v40 = vpop.xlane.xlu0 %1002 }
 0x3bb   : > { %v1013_v41 = vsub.f32 %v781_v28, %v1003_v40  ;;  %v1771_v28 = vld [vmem:[%s5152_s3 + $0x8] sm:$0xff] }
 0x3bc   : > { %v4171_v29 = vpack.c.bf16 %v1771_v28, %v1770_v27  ;;  %v3833_v28 = vld [vmem:[%s5153_s4] ss:$0 sm:$0xff] }
 0x3bd   : > { %v1017_v42 = vmul.f32 1.442695, %v1013_v41 }
 0x3bf   : > { %4296 = vpow2.f32 %v1017_v42 }
 0x3c9   : > { %v4297_v43 = vpop.eup %4296 }
 0x3ca   : > { %v1025_v44 = vsel %vm712_vm2, %v4297_v43, 0.0 }
 0x3cb   : > { %1026 = vadd.xlane.f32.xlu0 %v1025_v44 }
 0x407   : > { %v1006_v45 = vpop.xlane.xlu1 %1005 }
 0x408   : > { %v1014_v46 = vsub.f32 %v853_v31, %v1006_v45  ;;  %v1620_v31 = vunpack.c.l.s4 %v4478_v30 }
 0x40a   : > { %v1019_v47 = vmul.f32 1.442695, %v1014_v46  ;;  %v1621_v36 = vunpack.c.0.s8 %v1620_v31 }
 0x40b   : > { %v1009_v48 = vpop.xlane.xlu1 %1008 }
 0x40c   : > { %4298 = vpow2.f32 %v1019_v47  ;;  %v1015_v49 = vsub.f32 %v925_v34, %v1009_v48  ;;  %v4479_v34 = vmov 1934713408  }
 0x40d   : > { %v1652_v35 = vunpack.c.l.s4 %v4479_v34 }
 0x40e   : > { %v1021_v50 = vmul.f32 1.442695, %v1015_v49 }
 0x40f   : > { %v1012_v51 = vpop.xlane.xlu0 %1011  ;;  %v1046_v60 = vpop.permute.xlu1 %1045  ;;  %v1653_v39 = vunpack.c.0.s8 %v1652_v35 }
 0x410   : > { %4300 = vpow2.f32 %v1021_v50  ;;  %v1016_v52 = vsub.f32 %v997_v37, %v1012_v51  ;;  %v1623_v37 = vshrl.u32 %v1622_v32, 7 }
 0x412   : > { %v1023_v53 = vmul.f32 1.442695, %v1016_v52  ;;  %v4806_v40 = vsub.s32 %v1621_v36, %v1623_v37  ;;  %v4808_v47 = vsub.s32 %v1653_v39, %v1623_v37  ;;  %v1885_v39 = vld [vmem:[%s5154_s5] sm:$0xff] }
 0x413   : > { %v1050_v61 = vpop.permute.xlu1 %1049  ;;  %v1048_v62 = vpop.permute.xlu0 %1047 }
 0x414   : > { %4302 = vpow2.f32 %v1023_v53 }
 0x416   : > { %v4299_v54 = vpop.eup %4298 }
 0x417   : > { %v1028_v55 = vsel %vm712_vm2, %v4299_v54, 0.0  ;;  %v1052_v63 = vpop.permute.xlu1 %1051 }
 0x418   : > { %1029 = vadd.xlane.f32.xlu1 %v1028_v55 }
 0x41a   : > { %v4301_v56 = vpop.eup %4300 }
 0x41b   : > { %v1031_v57 = vsel %vm712_vm2, %v4301_v56, 0.0 }
 0x41c   : > { %1032 = vadd.xlane.f32.xlu0 %v1031_v57  ;;  %v1773_v57 = vld [vmem:[%s5152_s3 + $0x18] sm:$0xff] }
 0x41e   : > { %v4303_v58 = vpop.eup %4302 }
 0x41f   : > { %v1034_v59 = vsel %vm712_vm2, %v4303_v58, 0.0 }
 0x420   : > { %1035 = vadd.xlane.f32.xlu0 %v1034_v59 }
 0x44b   : > { %1057 = vxpose.xlu1.b32.start.end [1/1] (short) (narrow) %v1046_v60, 8 }
 0x44d   : > { %1089 = vxpose.xlu0.b32.start.end [1/1] (short) (narrow) %v1048_v62, 8 }
 0x44f   : > { %1153 = vxpose.xlu1.b32.start.end [1/1] (short) (narrow) %v1052_v63, 8 }
 0x451   : > { %1121 = vxpose.xlu0.b32.start.end [1/1] (short) (narrow) %v1050_v61, 8 }
 0x458   : > { %v1027_v2 = vpop.xlane.xlu0 %1026 }
 0x459   : > { %4304 = vrcp.f32 %v1027_v2 }
 0x463   : > { %v4305_v3 = vpop.eup %4304 }
 0x464   : > { %v1041_v4 = vmul.f32 %v4305_v3, %v4297_v43 }
 0x466   : > { %4012 = vmatpush3.xpose.msk.msra.mxu1 %vm712_vm2, %v1041_v4 }
 0x467   : > { %4021 = vmatprep.subr.mxu1 %v4472_v1 }
 0x4a5   : > { %v1030_v5 = vpop.xlane.xlu1 %1029 }
 0x4a6   : > { %4306 = vrcp.f32 %v1030_v5 }
 0x4a9   : > { %v1033_v9 = vpop.xlane.xlu0 %1032 }
 0x4aa   : > { %4308 = vrcp.f32 %v1033_v9 }
 0x4ad   : > { %v1036_v10 = vpop.xlane.xlu0 %1035 }
 0x4ae   : > { %4310 = vrcp.f32 %v1036_v10 }
 0x4b0   : > { %v4307_v6 = vpop.eup %4306 }
 0x4b1   : > { %v1042_v7 = vmul.f32 %v4307_v6, %v4299_v54 }
 0x4b3   : > { %4017 = vmatpush3.xpose.msk.msra.mxu0 %vm712_vm2, %v1042_v7 }
 0x4b4   : > { %4026 = vmatprep.subr.mxu0 %v4472_v1  ;;  %v4309_v11 = vpop.eup %4308 }
 0x4b5   : > { %v1043_v13 = vmul.f32 %v4309_v11, %v4301_v56  ;;  %v1772_v56 = vld [vmem:[%s5152_s3 + $0x10] sm:$0xff] }
 0x4b6   : > { %v4174_v62 = vpack.c.bf16 %v1773_v57, %v1772_v56 }
 0x4b8   : > { %v4311_v12 = vpop.eup %4310 }
 0x4b9   : > { %v1044_v15 = vmul.f32 %v4311_v12, %v4303_v58 }
 0x4cb   : > { %v1073_v14 = vpop.trf.xlu1 }
 0x4cc   : > { %4014 = vmatmul.mubr.msk.f32.vlgmr.msra.gmra.mrb[6].mxu1 %vm712_vm2, %v1073_v14 }
 0x4cd   : > { %4022 = vmatpush3.xpose.msk.msra.mxu1 %vm712_vm2, %v1043_v13  ;;  %v1105_v16 = vpop.trf.xlu0  ;;  %4023 = vmatprep.mubr.msk.f32.mxu1 %vm4471_vm0, %v4472_v1 }
 0x4ce   : > { %4019 = vmatmul.mubr.msk.f32.vlgmr.msra.gmra.mrb[4].mxu0 %vm712_vm2, %v1105_v16  ;;  %4182 = vmatprep.subr.bf16.mxu1 %v4470_v0 }
 0x4cf   : > { %4027 = vmatpush3.xpose.msk.msra.mxu0 %vm712_vm2, %v1044_v15  ;;  %v1169_v17 = vpop.trf.xlu1  ;;  %4028 = vmatprep.mubr.msk.f32.mxu0 %vm4471_vm0, %v4472_v1 }
 0x4d0   : > { %4170 = vmatprep.subr.bf16.mxu0 %v4470_v0 }
 0x4d1   : > { %v1137_v18 = vpop.trf.xlu0 }
 0x4d2   : > { %4024 = vmatmul.mubr.msk.f32.vlgmr.msra.gmra.mrb[8].mxu1 %vm712_vm2, %v1137_v18  ;;  %4029 = vmatmul.mubr.msk.f32.vlgmr.msra.gmra.mrb[6].mxu0 %vm712_vm2, %v1169_v17 }
 0x4d3   : > { %4039 = vmatprep.mubr.msk.f32.mxu0 %vm4471_vm0, %v4472_v1  ;;  %4069 = vmatprep.mubr.msk.f32.mxu1 %vm4471_vm0, %v4472_v1 }
 0x4d4   : > { %4172 = vmatpush3.bf16.msra.mxu0 %v4171_v29 }
 0x4d5   : > { %4173 = vmatprep.subr.bf16.mxu0 %v4470_v0 }
 0x4d8   : > { %4175 = vmatpush3.bf16.msra.mxu0 %v4174_v62 }
 0x4d9   : > { %4176 = vmatprep.subr.bf16.mxu0 %v4470_v0 }
 0x59f   : > { %v1257_v19 = vpop.f32.mrb[6].mxu1 }
 0x5a0   : > { %v4015_v20 = vpop.f32.mrb[7].mxu1  ;;  %1489 = vxpose.xlu0.b32.start.end [1/1] (short) (narrow) %v1257_v19, 8 }
 0x5a1   : > { %v1333_v21 = vpop.f32.mrb[4].mxu0 }
 0x5a2   : > { %1521 = vxpose.xlu1.b32.start.end [1/1] (short) (narrow) %v1333_v21, 8  ;;  %v4020_v22 = vpop.f32.mrb[5].mxu0 }
 0x5a5   : > { %v1409_v23 = vpop.f32.mrb[8].mxu1  ;;  %v1485_v24 = vpop.f32.mrb[6].mxu0 }
 0x5a6   : > { %1553 = vxpose.xlu0.b32.start.end [1/1] (short) (narrow) %v1409_v23, 8  ;;  %v4025_v25 = vpop.f32.mrb[9].mxu1  ;;  %1585 = vxpose.xlu1.b32.start.end [1/1] (short) (narrow) %v1485_v24, 8  ;;  %v4030_v26 = vpop.f32.mrb[7].mxu0 }
 0x620   : > { %v1505_v33 = vpop.trf.xlu0 }
 0x622   : > { %v1537_v38 = vpop.trf.xlu1 }
 0x626   : > { %v1569_v41 = vpop.trf.xlu0  ;;  %v1601_v42 = vpop.trf.xlu1 }
 0x627   : > { %v1617_v43 = vcombine.low %v1505_v33, %v1569_v41  ;;  %v1618_v44 = vcombine.high %v1505_v33, %v1569_v41  ;;  %v1633_v45 = vcombine.low %v1537_v38, %v1601_v42  ;;  %v1634_v46 = vcombine.high %v1537_v38, %v1601_v42  ;;  %v1886_v41 = vld [vmem:[%s5154_s5 + $0x8] sm:$0xff] }
 0x628   : > { %v4177_v42 = vpack.c.bf16 %v1886_v41, %v1885_v39 }
 0x629   : > { %v1625_v48 = vrot.slane %v1617_v43, %v4806_v40  ;;  %v1632_v49 = vrot.slane %v1618_v44, %v4806_v40  ;;  %v1641_v50 = vrot.slane %v1633_v45, %v4806_v40  ;;  %v1648_v51 = vrot.slane %v1634_v46, %v4806_v40  ;;  %v1888_v43 = vld [vmem:[%s5154_s5 + $0x18] sm:$0xff]  ;;  %v1970_v45 = vld [vmem:[%s5156_s7] sm:$0xff]  ;;  %v1971_v46 = vld [vmem:[%s5156_s7 + $0x8] sm:$0xff] }
 0x62b   : > { %v1649_v52 = vcombine.low %v1625_v48, %v1641_v50  ;;  %v1650_v53 = vcombine.high %v1625_v48, %v1641_v50  ;;  %v1665_v54 = vcombine.low %v1632_v49, %v1648_v51  ;;  %v1666_v55 = vcombine.high %v1632_v49, %v1648_v51  ;;  %v1972_v48 = vld [vmem:[%s5156_s7 + $0x10] sm:$0xff]  ;;  %v1973_v50 = vld [vmem:[%s5156_s7 + $0x18] sm:$0xff] }
 0x62c   : > { %v4183_v49 = vpack.c.bf16 %v1971_v46, %v1970_v45  ;;  %v4186_v51 = vpack.c.bf16 %v1973_v50, %v1972_v48 }
 0x62d   : > { %v1657_v58 = vrot.slane %v1649_v52, %v4808_v47  ;;  %v1664_v59 = vrot.slane %v1650_v53, %v4808_v47  ;;  %v1673_v60 = vrot.slane %v1665_v54, %v4808_v47  ;;  %v1680_v61 = vrot.slane %v1666_v55, %v4808_v47  ;;  %v1974_v52 = vld [vmem:[%s5156_s7 + $0x20] sm:$0xff]  ;;  %v1975_v53 = vld [vmem:[%s5156_s7 + $0x28] sm:$0xff] }
 0x62e   : > { %4184 = vmatpush3.bf16.msra.mxu1 %v4183_v49  ;;  %v4189_v54 = vpack.c.bf16 %v1975_v53, %v1974_v52 }
 0x62f   : > { %v1685_v63 = vcombine.low %v1657_v58, %v1664_v59  ;;  %v3831_v2 = vcombine.high %v1657_v58, %v1664_v59  ;;  %v1701_v3 = vcombine.low %v1673_v60, %v1680_v61  ;;  %v3832_v4 = vcombine.high %v1673_v60, %v1680_v61  ;;  %4185 = vmatprep.subr.bf16.mxu1 %v4470_v0  ;;  %v3835_v59 = vld [vmem:[%s5158_s9] ss:$0 sm:$0xff] }
 0x630   : > { %v3836_v61 = vld [vmem:[%s5159_s10] ss:$0 sm:$0xff] }
 0x631   : > { %v1692_v5 = vrot.slane %v1685_v63, %v4806_v40  ;;  %v1700_v6 = vrot.slane %v3831_v2, %v4806_v40  ;;  %v1708_v7 = vrot.slane %v1701_v3, %v4806_v40  ;;  %v1716_v9 = vrot.slane %v3832_v4, %v4806_v40  ;;  %v1976_v2 = vld [vmem:[%s5156_s7 + $0x30] sm:$0xff]  ;;  %v1977_v3 = vld [vmem:[%s5156_s7 + $0x38] sm:$0xff] }
 0x632   : > { %4187 = vmatpush3.bf16.msra.mxu1 %v4186_v51  ;;  %v4192_v4 = vpack.c.bf16 %v1977_v3, %v1976_v2 }
 0x633   : > { %v1718_v10 = vcombine.high %v1692_v5, %v1700_v6  ;;  %v1734_v11 = vcombine.high %v1708_v7, %v1716_v9  ;;  %v1717_v12 = vcombine.low %v1692_v5, %v1700_v6  ;;  %v1733_v13 = vcombine.low %v1708_v7, %v1716_v9  ;;  %4188 = vmatprep.subr.bf16.mxu1 %v4470_v0  ;;  %v3837_v5 = vld [vmem:[#allocation5] ss:$0 sm:$0xff] }
 0x635   : > { %v1732_v14 = vrot.slane %v1718_v10, %v4808_v47  ;;  %v1748_v15 = vrot.slane %v1734_v11, %v4808_v47  ;;  %v1725_v16 = vrot.slane %v1717_v12, %v4808_v47  ;;  %v1741_v17 = vrot.slane %v1733_v13, %v4808_v47  ;;  %v3839_v11 = vld [vmem:[%s5157_s8] ss:$0 sm:$0xff] }
 0x636   : > { %4190 = vmatpush3.bf16.msra.mxu1 %v4189_v54 }
 0x637   : > { %v1751_v18 = vcombine.low %v1732_v14, %v1748_v15  ;;  %v1750_v19 = vcombine.high %v1725_v16, %v1741_v17  ;;  %v1749_v20 = vcombine.low %v1725_v16, %v1741_v17  ;;  %v1752_v21 = vcombine.high %v1732_v14, %v1748_v15  ;;  %4191 = vmatprep.subr.bf16.mxu1 %v4470_v0 }
 0x639   : > { %1758 = vrot.lane.b32.xlu1 %v1751_v18, %s5176_s22  ;;  %1754 = vrot.lane.b32.xlu0 %v1750_v19, %s5175_s15 }
 0x63a   : > { %4193 = vmatpush3.bf16.msra.mxu1 %v4192_v4 }
 0x63b   : > { %4093 = vmatprep.subr.mxu1 %v4472_v1 }
 0x63d   : > { %1762 = vrot.lane.b32.xlu1 %v1752_v21, %s5174_s30  ;;  %s5199_s30 = smov %s5198_s25 }
 0x6ab   : > { %v1759_v22 = vpop.permute.xlu1 %1758  ;;  %v1755_v23 = vpop.permute.xlu0 %1754 }
 0x6ac   : > { %v1765_v24 = vsel %vm712_vm2, %v1749_v20, %v1755_v23  ;;  %v3844_v23 = vld [vmem:[%s5150_s1 + $0x28] sm:$0xff] }
 0x6ad   : > { %v1767_v26 = vsel %vm1766_vm3, %v1765_v24, %v1759_v22  ;;  %v3843_v22 = vld [vmem:[%s5150_s1 + $0x20] sm:$0xff] }
 0x6ae   : > { %v4195_v24 = vpack.c.bf16 %v3844_v23, %v3843_v22 }
 0x6af   : > { %v1763_v25 = vpop.permute.xlu1 %1762 }
 0x6b0   : > { %v1769_v27 = vsel %vm1768_vm4, %v1767_v26, %v1763_v25  ;;  %v3845_v25 = vld [vmem:[%s5150_s1 + $0x30] sm:$0xff]  ;;  %v3846_v26 = vld [vmem:[%s5150_s1 + $0x38] sm:$0xff] }
 0x6b1   : > { %4040 = vmatmul.mubr.msk.f32.vlgmr.msra.gmra.mrb[8].mxu0 %vm483_vm1, %v1769_v27  ;;  %v4198_v27 = vpack.c.bf16 %v3846_v26, %v3845_v25 }
 0x6b2   : > { %4050 = vmatprep.mubr.msk.f32.mxu0 %vm4471_vm0, %v4472_v1  ;;  %4178 = vmatpush3.bf16.msra.mxu0 %v4177_v42 }
 0x6b3   : > { %4179 = vmatprep.subr.bf16.mxu0 %v4470_v0 }
 0x784   : > { %v1850_v29 = vpop.f32.mrb[8].mxu0 }
 0x785   : > { %v1851_v30 = vadd.f32 %v3833_v28, %v1850_v29  ;;  %v4041_v31 = vpop.f32.mrb[9].mxu0 }
 0x787   : > { %v1854_v32 = vadd.f32 %v1851_v30, %v4723_v8  ;;  %v1887_v8 = vld [vmem:[%s5154_s5 + $0x10] sm:$0xff] }
 0x788   : > { %v4180_v44 = vpack.c.bf16 %v1888_v43, %v1887_v8 }
 0x789   : > { %v1857_v33 = vsel %vm483_vm1, %v1854_v32, 0.0 }
 0x78a   : > { %1858 = vadd.xlane.f32.xlu1 %v1857_v33  ;;  %4181 = vmatpush3.bf16.msra.mxu0 %v4180_v44 }
 0x78b   : > { %4194 = vmatprep.subr.bf16.mxu0 %v4470_v0 }
 0x817   : > { %v1859_v34 = vpop.xlane.xlu1 %1858 }
 0x818   : > { %v1861_v35 = vmul.f32 0.03125, %v1859_v34  ;;  %v3842_v34 = vld [vmem:[%s5200_s12] ss:$0 sm:$0xff] }
 0x81a   : > { %v1862_v36 = vsub.f32 %v1854_v32, %v1861_v35  ;;  %v3841_v32 = vld [vmem:[%s5198_s25] ss:$0 sm:$0xff]  ;;  %s470_s25 = scalar_lea.vmem [#allocation7], %s5205_s23 }
 0x81b   : > { %s3727_s22 = sshll.u32 %s470_s25, 4  ;;  %s5106_s22 = int_to_ptr.vmem [resolvable:$true] %s3727_s22 }
 0x81c   : > { %v1863_v37 = vmul.f32 %v1862_v36, %v1862_v36 }
 0x81e   : > { %v1864_v38 = vsel %vm483_vm1, %v1863_v37, 0.0  ;;  %v3848_v37 = vld [vmem:[%s5151_s2 + $0x1] ss:$0 sm:$0xff] }
 0x81f   : > { %1865 = vadd.xlane.f32.xlu0 %v1864_v38 }
 0x8ac   : > { %v1866_v55 = vpop.xlane.xlu0 %1865 }
 0x8ad   : > { %v1867_v56 = vmul.f32 0.03125, %v1866_v55 }
 0x8af   : > { %v1868_v57 = vadd.f32 1e-05, %v1867_v56 }
 0x8b1   : > { %4312 = vrsqrt.f32 %v1868_v57 }
 0x8bb   : > { %v4313_v58 = vpop.eup %4312 }
 0x8bc   : > { %v1870_v60 = vmul.f32 %v4313_v58, %v1862_v36 }
 0x8be   : > { %v1877_v62 = vmul.f32 %v3835_v59, %v1870_v60 }
 0x8c0   : > { %v1884_v63 = vadd.f32 %v3836_v61, %v1877_v62 }
 0x8c2   : > { %4051 = vmatmul.mubr.msk.f32.vlgmr.msra.gmra.mrb[10].mxu0 %vm483_vm1, %v1884_v63 }
 0x8c3   : > { %4080 = vmatprep.mubr.msk.f32.mxu0 %vm4471_vm0, %v4472_v1  ;;  %4196 = vmatpush3.bf16.msra.mxu0 %v4195_v24 }
 0x8c4   : > { %4197 = vmatprep.subr.bf16.mxu0 %v4470_v0 }
 0x8c7   : > { %4199 = vmatpush3.bf16.msra.mxu0 %v4198_v27 }
 0x8c8   : > { %4083 = vmatprep.subr.mxu0 %v4472_v1 }
 0x995   : > { %v1965_v6 = vpop.f32.mrb[10].mxu0 }
 0x996   : > { %v1966_v7 = vadd.f32 %v3837_v5, %v1965_v6  ;;  %v4052_v9 = vpop.f32.mrb[11].mxu0 }
 0x998   : > { %v1969_v10 = vmax.f32 %v1966_v7, 0.0 }
 0x99a   : > { %4070 = vmatmul.mubr.msk.f32.vlgmr.msra.gmra.mrb[10].mxu1 %vm1985_vm5, %v1969_v10 }
 0x99b   : > { %4095 = vmatprep.mubr.msk.f32.mxu1 %vm4471_vm0, %v4472_v1 }
 0xa6d   : > { %v2055_v12 = vpop.f32.mrb[10].mxu1 }
 0xa6e   : > { %v2056_v13 = vadd.f32 %v3839_v11, %v2055_v12  ;;  %v4071_v14 = vpop.f32.mrb[11].mxu1 }
 0xa70   : > { %v2059_v15 = vadd.f32 %v2056_v13, %v1884_v63 }
 0xa72   : > { %v2062_v16 = vsel %vm483_vm1, %v2059_v15, 0.0 }
 0xa73   : > { %2063 = vadd.xlane.f32.xlu0 %v2062_v16 }
 0xb00   : > { %v2064_v17 = vpop.xlane.xlu0 %2063 }
 0xb01   : > { %v2065_v18 = vmul.f32 0.03125, %v2064_v17 }
 0xb03   : > { %v2066_v19 = vsub.f32 %v2059_v15, %v2065_v18 }
 0xb05   : > { %v2067_v20 = vmul.f32 %v2066_v19, %v2066_v19 }
 0xb07   : > { %v2068_v21 = vsel %vm483_vm1, %v2067_v20, 0.0 }
 0xb08   : > { %2069 = vadd.xlane.f32.xlu1 %v2068_v21 }
 0xb95   : > { %v2070_v28 = vpop.xlane.xlu1 %2069 }
 0xb96   : > { %v2071_v29 = vmul.f32 0.03125, %v2070_v28 }
 0xb98   : > { %v2072_v30 = vadd.f32 1e-05, %v2071_v29 }
 0xb9a   : > { %4314 = vrsqrt.f32 %v2072_v30 }
 0xba4   : > { %v4315_v31 = vpop.eup %4314 }
 0xba5   : > { %v2074_v33 = vmul.f32 %v4315_v31, %v2066_v19 }
 0xba7   : > { %v2081_v35 = vmul.f32 %v3841_v32, %v2074_v33 }
 0xba9   : > { %v4927_v36 = vadd.f32 %v3842_v34, %v2081_v35 }
 0xbab   : > { %4081 = vmatmul.mubr.msk.f32.vlgmr.msra.gmra.mrb[12].mxu0 %vm483_vm1, %v4927_v36 }
 0xbac   : > { %4085 = vmatprep.mubr.msk.f32.mxu0 %vm4471_vm0, %v4472_v1 }
 0xc7e   : > { %v2171_v38 = vpop.f32.mrb[12].mxu0 }
 0xc7f   : > { %v2172_v39 = vadd.f32 %v3848_v37, %v2171_v38  ;;  %v4082_v41 = vpop.f32.mrb[13].mxu0 }
 0xc81   : > { %2186 = vrot.lane.b32.xlu1 %v2172_v39, %s4476_s16  ;;  %2184 = vrot.lane.b32.xlu0 %v2172_v39, %s4474_s19  ;;  %v2175_v43 = vmul.f32 0.35355338, %v2172_v39 }
 0xc85   : > { %2188 = vrot.lane.b32.xlu1 %v2172_v39, %s4473_s17  ;;  %2190 = vrot.lane.b32.xlu0 %v2172_v39, %s4475_s14 }
 0xcf3   : > { %v2187_v42 = vpop.permute.xlu1 %2186  ;;  %v2185_v8 = vpop.permute.xlu0 %2184 }
 0xcf4   : > { %2194 = vrot.lane.b32.xlu0 %v2187_v42, %s4475_s14  ;;  %2192 = vrot.lane.b32.xlu1 %v2185_v8, %s4475_s14 }
 0xcf7   : > { %v2189_v44 = vpop.permute.xlu1 %2188  ;;  %v2191_v45 = vpop.permute.xlu0 %2190 }
 0xcf8   : > { %2196 = vrot.lane.b32.xlu1 %v2189_v44, %s4475_s14  ;;  %2177 = vrot.lane.b32.xlu0 %v2175_v43, %s4474_s19  ;;  %s4394_s19 = scalar_lea.vmem %s5106_s22, 128  ;;  %s4398_s14 = sshll.u32 %s4483_s29, 4  ;;  %s4399_s14 = int_to_ptr.vmem [resolvable:$false] %s4398_s14 }
 0xcf9   : > { %p4395_p4 = scmp.ne.s32.totalorder %s5106_s22, %s4394_s19  ;;  %p4401_p10 = scmp.lt.s32.totalorder %s5106_s22, %s4399_s14 }
 0xcfb   : > { %p4396_p6 = pnand %p4395_p4, %p4645_p12 }
 0xcfc   : > { %2179 = vrot.lane.b32.xlu1 %v2175_v43, %s4476_s16  ;;  %2181 = vrot.lane.b32.xlu0 %v2175_v43, %s4473_s17  ;;  %s5201_s17 = smov 64   ;;  %s4400_s16 = scalar_lea.vmem %s4399_s14, 256 }
 0xcfd   : > { %p4397_p8 = pneg %p4396_p6  ;;  %p4402_p13 = scmp.lt.s32.totalorder %s4400_s16, %s4394_s19 }
 0xcff   : > { %p4403_p3 = por %p4402_p13, %p4401_p10 }
 0xd01   : > { %p4404_p7 = pnand %p4403_p3, %p4397_p8 }
 0xd25   : > { %2202 = vxpose.xlu1.b32.start.end [1/1] (short) (narrow) %v2191_v45, 8 }
 0xd66   : > { %v2193_v46 = vpop.permute.xlu1 %2192  ;;  %v2195_v48 = vpop.permute.xlu0 %2194 }
 0xd67   : > { %2234 = vxpose.xlu0.b32.start.end [1/1] (short) (narrow) %v2193_v46, 8 }
 0xd6a   : > { %v2197_v49 = vpop.permute.xlu1 %2196  ;;  %v2178_v52 = vpop.permute.xlu0 %2177 }
 0xd6b   : > { %2266 = vxpose.xlu0.b32.start.end [1/1] (short) (narrow) %v2195_v48, 8 }
 0xd6e   : > { %v2180_v50 = vpop.permute.xlu1 %2179  ;;  %v2182_v53 = vpop.permute.xlu0 %2181 }
 0xd6f   : > { %2298 = vxpose.xlu0.b32.start.end [1/1] (short) (narrow) %v2197_v49, 8 }
 0xda5   : > { %v2218_v51 = vpop.trf.xlu1 }
 0xda6   : > { %4084 = vmatpush3.msra.mxu0 %v2218_v51 }
 0xda7   : > { %4086 = vmatmul.mubr.msk.f32.vlgmr.msra.gmra.mrb[14].mxu0 %vm712_vm2, %v2175_v43  ;;  %4088 = vmatprep.subr.mxu0 %v4472_v1 }
 0xda8   : > { %4090 = vmatprep.mubr.msk.f32.mxu0 %vm4471_vm0, %v4472_v1 }
 0xde7   : > { %v2250_v54 = vpop.trf.xlu0 }
 0xde8   : > { %4089 = vmatpush3.msra.mxu0 %v2250_v54 }
 0xde9   : > { %4091 = vmatmul.mubr.msk.f32.vlgmr.msra.gmra.mrb[16].mxu0 %vm712_vm2, %v2178_v52  ;;  %4098 = vmatprep.subr.mxu0 %v4472_v1 }
 0xdea   : > { %4100 = vmatprep.mubr.msk.f32.mxu0 %vm4471_vm0, %v4472_v1 }
 0xdeb   : > { %v2282_v55 = vpop.trf.xlu0 }
 0xdec   : > { %4094 = vmatpush3.msra.mxu1 %v2282_v55 }
 0xded   : > { %4096 = vmatmul.mubr.msk.f32.vlgmr.msra.gmra.mrb[12].mxu1 %vm712_vm2, %v2180_v50  ;;  %4103 = vmatprep.subr.mxu1 %v4472_v1 }
 0xdee   : > { %4105 = vmatprep.mubr.msk.f32.mxu1 %vm4471_vm0, %v4472_v1 }
 0xdef   : > { %v2314_v56 = vpop.trf.xlu0 }
 0xdf0   : > { %4099 = vmatpush3.msra.mxu0 %v2314_v56 }
 0xdf1   : > { %4101 = vmatmul.mubr.msk.f32.vlgmr.msra.gmra.mrb[18].mxu0 %vm712_vm2, %v2182_v53  ;;  %4108 = vmatprep.subr.mxu0 %v4472_v1 }
 0xdf2   : > { %4110 = vmatprep.mubr.msk.f32.mxu0 %vm4471_vm0, %v4472_v1 }
 0xe7a   : > { %v2398_v57 = vpop.f32.mrb[14].mxu0 }
 0xe7b   : > { %v4087_v58 = vpop.f32.mrb[15].mxu0  ;;  %v2618_v59 = vsel %vm712_vm2, %v2398_v57, -inf }
 0xe7c   : > { %2619 = vmax.xlane.f32.xlu1 %v2618_v59  ;;  %v3864_v58 = vld [vmem:[%s5152_s3 + $0x20] sm:$0xff]  ;;  %v3865_v59 = vld [vmem:[%s5152_s3 + $0x28] sm:$0xff] }
 0xebc   : > { %v2470_v60 = vpop.f32.mrb[16].mxu0 }
 0xebd   : > { %v4092_v61 = vpop.f32.mrb[17].mxu0  ;;  %v2621_v62 = vsel %vm712_vm2, %v2470_v60, -inf }
 0xebe   : > { %2622 = vmax.xlane.f32.xlu0 %v2621_v62 }
 0xec0   : > { %v2542_v63 = vpop.f32.mrb[12].mxu1 }
 0xec1   : > { %v4097_v2 = vpop.f32.mrb[13].mxu1  ;;  %v2624_v3 = vsel %vm712_vm2, %v2542_v63, -inf }
 0xec2   : > { %2625 = vmax.xlane.f32.xlu1 %v2624_v3 }
 0xec4   : > { %v2614_v4 = vpop.f32.mrb[18].mxu0 }
 0xec5   : > { %v4102_v5 = vpop.f32.mrb[19].mxu0  ;;  %v2627_v6 = vsel %vm712_vm2, %v2614_v4, -inf }
 0xec6   : > { %2628 = vmax.xlane.f32.xlu1 %v2627_v6 }
 0xed4   : > { %2662 = vrot.lane.b32.xlu0 %v2172_v39, %s5201_s17 }
 0xed7   : > { %2664 = vrot.lane.b32.xlu1 %v2185_v8, %s5201_s17 }
 0xed8   : > { %2668 = vrot.lane.b32.xlu0 %v2189_v44, %s5201_s17 }
 0xedb   : > { %2666 = vrot.lane.b32.xlu1 %v2187_v42, %s5201_s17  ;;  %s5204_s17 = smov 24  }
 0xf09   : > { %v2620_v7 = vpop.xlane.xlu1 %2619 }
 0xf0a   : > { %v2630_v9 = vsub.f32 %v2398_v57, %v2620_v7 }
 0xf0c   : > { %v2634_v10 = vmul.f32 1.442695, %v2630_v9 }
 0xf0e   : > { %4316 = vpow2.f32 %v2634_v10 }
 0xf18   : > { %v4317_v11 = vpop.eup %4316 }
 0xf19   : > { %v2642_v12 = vsel %vm712_vm2, %v4317_v11, 0.0 }
 0xf1a   : > { %2643 = vadd.xlane.f32.xlu1 %v2642_v12 }
 0xf4b   : > { %v2623_v13 = vpop.xlane.xlu0 %2622 }
 0xf4c   : > { %v2631_v14 = vsub.f32 %v2470_v60, %v2623_v13  ;;  %v4201_v60 = vpack.c.bf16 %v3865_v59, %v3864_v58 }
 0xf4e   : > { %v2636_v15 = vmul.f32 1.442695, %v2631_v14 }
 0xf4f   : > { %v2626_v16 = vpop.xlane.xlu1 %2625  ;;  %v2663_v29 = vpop.permute.xlu0 %2662 }
 0xf50   : > { %4318 = vpow2.f32 %v2636_v15  ;;  %v2632_v17 = vsub.f32 %v2542_v63, %v2626_v16  ;;  %v3866_v16 = vld [vmem:[%s5152_s3 + $0x30] sm:$0xff] }
 0xf52   : > { %v2638_v18 = vmul.f32 1.442695, %v2632_v17  ;;  %v3867_v17 = vld [vmem:[%s5152_s3 + $0x38] sm:$0xff] }
 0xf53   : > { %v2629_v19 = vpop.xlane.xlu1 %2628  ;;  %v2669_v31 = vpop.permute.xlu0 %2668 }
 0xf54   : > { %4320 = vpow2.f32 %v2638_v18  ;;  %v2633_v20 = vsub.f32 %v2614_v4, %v2629_v19 }
 0xf56   : > { %v2640_v21 = vmul.f32 1.442695, %v2633_v20 }
 0xf57   : > { %v2665_v28 = vpop.permute.xlu1 %2664 }
 0xf58   : > { %4322 = vpow2.f32 %v2640_v21 }
 0xf5a   : > { %v4319_v22 = vpop.eup %4318 }
 0xf5b   : > { %v2645_v23 = vsel %vm712_vm2, %v4319_v22, 0.0  ;;  %v2667_v30 = vpop.permute.xlu1 %2666 }
 0xf5c   : > { %2646 = vadd.xlane.f32.xlu0 %v2645_v23 }
 0xf5e   : > { %v4321_v24 = vpop.eup %4320 }
 0xf5f   : > { %v2648_v25 = vsel %vm712_vm2, %v4321_v24, 0.0 }
 0xf60   : > { %2649 = vadd.xlane.f32.xlu0 %v2648_v25 }
 0xf62   : > { %v4323_v26 = vpop.eup %4322 }
 0xf63   : > { %v2651_v27 = vsel %vm712_vm2, %v4323_v26, 0.0 }
 0xf64   : > { %2652 = vadd.xlane.f32.xlu1 %v2651_v27 }
 0xf8d   : > { %2674 = vxpose.xlu0.b32.start.end [1/1] (short) (narrow) %v2663_v29, 8 }
 0xf91   : > { %2738 = vxpose.xlu0.b32.start.end [1/1] (short) (narrow) %v2667_v30, 8 }
 0xf95   : > { %2770 = vxpose.xlu0.b32.start.end [1/1] (short) (narrow) %v2669_v31, 8 }
 0xf97   : > { %2706 = vxpose.xlu1.b32.start.end [1/1] (short) (narrow) %v2665_v28, 8 }
 0xfa7   : > { %v2644_v32 = vpop.xlane.xlu1 %2643 }
 0xfa8   : > { %4324 = vrcp.f32 %v2644_v32 }
 0xfb2   : > { %v4325_v33 = vpop.eup %4324 }
 0xfb3   : > { %v2658_v34 = vmul.f32 %v4325_v33, %v4317_v11 }
 0xfb5   : > { %4104 = vmatpush3.xpose.msk.msra.mxu1 %vm712_vm2, %v2658_v34 }
 0xfb6   : > { %4113 = vmatprep.subr.mxu1 %v4472_v1 }
 0xfe9   : > { %v2647_v35 = vpop.xlane.xlu0 %2646 }
 0xfea   : > { %4326 = vrcp.f32 %v2647_v35 }
 0xfed   : > { %v2650_v39 = vpop.xlane.xlu0 %2649 }
 0xfee   : > { %4328 = vrcp.f32 %v2650_v39 }
 0xff1   : > { %v2653_v41 = vpop.xlane.xlu1 %2652 }
 0xff2   : > { %4330 = vrcp.f32 %v2653_v41 }
 0xff4   : > { %v4327_v37 = vpop.eup %4326 }
 0xff5   : > { %v2659_v38 = vmul.f32 %v4327_v37, %v4319_v22  ;;  %v4204_v22 = vpack.c.bf16 %v3867_v17, %v3866_v16  ;;  %v3873_v16 = vld [vmem:[%s5158_s9 + $0x1] ss:$0 sm:$0xff] }
 0xff7   : > { %4109 = vmatpush3.xpose.msk.msra.mxu0 %vm712_vm2, %v2659_v38 }
 0xff8   : > { %4118 = vmatprep.subr.mxu0 %v4472_v1  ;;  %v4329_v42 = vpop.eup %4328 }
 0xff9   : > { %v2660_v8 = vmul.f32 %v4329_v42, %v4321_v24 }
 0xffc   : > { %v4331_v45 = vpop.eup %4330 }
 0xffd   : > { %v2661_v46 = vmul.f32 %v4331_v45, %v4323_v26 }
0x100d   : > { %v2690_v43 = vpop.trf.xlu0 }
0x100e   : > { %4106 = vmatmul.mubr.msk.f32.vlgmr.msra.gmra.mrb[14].mxu1 %vm712_vm2, %v2690_v43 }
0x100f   : > { %4114 = vmatpush3.xpose.msk.msra.mxu1 %vm712_vm2, %v2660_v8  ;;  %4115 = vmatprep.mubr.msk.f32.mxu1 %vm4471_vm0, %v4472_v1 }
0x1010   : > { %4200 = vmatprep.subr.bf16.mxu1 %v4470_v0 }
0x1011   : > { %v2754_v44 = vpop.trf.xlu0 }
0x1012   : > { %4116 = vmatmul.mubr.msk.f32.vlgmr.msra.gmra.mrb[16].mxu1 %vm712_vm2, %v2754_v44 }
0x1013   : > { %4131 = vmatprep.mubr.msk.f32.mxu1 %vm4471_vm0, %v4472_v1  ;;  %4202 = vmatpush3.bf16.msra.mxu1 %v4201_v60  ;;  %v3876_v60 = vld [vmem:[%s5154_s5 + $0x28] sm:$0xff] }
0x1014   : > { %4203 = vmatprep.subr.bf16.mxu1 %v4470_v0 }
0x1015   : > { %v2786_v49 = vpop.trf.xlu0 }
0x1017   : > { %v2722_v48 = vpop.trf.xlu1  ;;  %4205 = vmatpush3.bf16.msra.mxu1 %v4204_v22 }
0x1018   : > { %4111 = vmatmul.mubr.msk.f32.vlgmr.msra.gmra.mrb[20].mxu0 %vm712_vm2, %v2722_v48  ;;  %4212 = vmatprep.subr.bf16.mxu1 %v4470_v0 }
0x1019   : > { %4119 = vmatpush3.xpose.msk.msra.mxu0 %vm712_vm2, %v2661_v46  ;;  %4120 = vmatprep.mubr.msk.f32.mxu0 %vm4471_vm0, %v4472_v1 }
0x101a   : > { %4206 = vmatprep.subr.bf16.mxu0 %v4470_v0 }
0x101c   : > { %4121 = vmatmul.mubr.msk.f32.vlgmr.msra.gmra.mrb[22].mxu0 %vm712_vm2, %v2786_v49 }
0x101d   : > { %4142 = vmatprep.mubr.msk.f32.mxu0 %vm4471_vm0, %v4472_v1 }
0x10e1   : > { %v2874_v50 = vpop.f32.mrb[14].mxu1 }
0x10e2   : > { %v4107_v51 = vpop.f32.mrb[15].mxu1  ;;  %3106 = vxpose.xlu1.b32.start.end [1/1] (short) (narrow) %v2874_v50, 8 }
0x10e5   : > { %v3026_v52 = vpop.f32.mrb[16].mxu1 }
0x10e6   : > { %v4117_v53 = vpop.f32.mrb[17].mxu1  ;;  %3170 = vxpose.xlu1.b32.start.end [1/1] (short) (narrow) %v3026_v52, 8 }
0x10eb   : > { %v2950_v54 = vpop.f32.mrb[20].mxu0 }
0x10ec   : > { %3138 = vxpose.xlu0.b32.start.end [1/1] (short) (narrow) %v2950_v54, 8  ;;  %v4112_v55 = vpop.f32.mrb[21].mxu0 }
0x10ef   : > { %v3102_v56 = vpop.f32.mrb[22].mxu0 }
0x10f0   : > { %3202 = vxpose.xlu0.b32.start.end [1/1] (short) (narrow) %v3102_v56, 8  ;;  %v4122_v57 = vpop.f32.mrb[23].mxu0 }
0x1162   : > { %v3122_v61 = vpop.trf.xlu1 }
0x1166   : > { %v3186_v63 = vpop.trf.xlu1 }
0x1167   : > { %v3234_v2 = vcombine.low %v3122_v61, %v3186_v63  ;;  %v3235_v3 = vcombine.high %v3122_v61, %v3186_v63 }
0x1169   : > { %v3242_v7 = vrot.slane %v3234_v2, %v4806_v40  ;;  %v3249_v9 = vrot.slane %v3235_v3, %v4806_v40  ;;  %v3881_v2 = vld [vmem:[%s5156_s7 + $0x40] sm:$0xff]  ;;  %v3882_v3 = vld [vmem:[%s5156_s7 + $0x48] sm:$0xff] }
0x116c   : > { %v3154_v62 = vpop.trf.xlu0 }
0x1170   : > { %v3218_v4 = vpop.trf.xlu0 }
0x1171   : > { %v3250_v5 = vcombine.low %v3154_v62, %v3218_v4  ;;  %v3251_v6 = vcombine.high %v3154_v62, %v3218_v4  ;;  %v3878_v62 = vld [vmem:[%s5154_s5 + $0x38] sm:$0xff]  ;;  %v3883_v4 = vld [vmem:[%s5156_s7 + $0x50] sm:$0xff] }
0x1173   : > { %v3258_v10 = vrot.slane %v3250_v5, %v4806_v40  ;;  %v3265_v11 = vrot.slane %v3251_v6, %v4806_v40  ;;  %v4213_v5 = vpack.c.bf16 %v3882_v3, %v3881_v2  ;;  %v3884_v6 = vld [vmem:[%s5156_s7 + $0x58] sm:$0xff] }
0x1175   : > { %v3266_v12 = vcombine.low %v3242_v7, %v3258_v10  ;;  %v3267_v13 = vcombine.high %v3242_v7, %v3258_v10  ;;  %v3282_v14 = vcombine.low %v3249_v9, %v3265_v11  ;;  %v3283_v15 = vcombine.high %v3249_v9, %v3265_v11  ;;  %v3885_v9 = vld [vmem:[%s5156_s7 + $0x60] sm:$0xff]  ;;  %v3886_v10 = vld [vmem:[%s5156_s7 + $0x68] sm:$0xff] }
0x1176   : > { %v4216_v7 = vpack.c.bf16 %v3884_v6, %v3883_v4  ;;  %v4219_v11 = vpack.c.bf16 %v3886_v10, %v3885_v9 }
0x1177   : > { %v3274_v18 = vrot.slane %v3266_v12, %v4808_v47  ;;  %v3281_v19 = vrot.slane %v3267_v13, %v4808_v47  ;;  %v3290_v20 = vrot.slane %v3282_v14, %v4808_v47  ;;  %v3297_v21 = vrot.slane %v3283_v15, %v4808_v47 }
0x1179   : > { %v3302_v23 = vcombine.low %v3274_v18, %v3281_v19  ;;  %v3862_v24 = vcombine.high %v3274_v18, %v3281_v19  ;;  %v3318_v25 = vcombine.low %v3290_v20, %v3297_v21  ;;  %v3863_v26 = vcombine.high %v3290_v20, %v3297_v21  ;;  %v3874_v18 = vld [vmem:[%s5159_s10 + $0x1] ss:$0 sm:$0xff]  ;;  %v3888_v21 = vld [vmem:[%s5156_s7 + $0x78] sm:$0xff] }
0x117b   : > { %v3309_v27 = vrot.slane %v3302_v23, %v4806_v40  ;;  %v3317_v28 = vrot.slane %v3862_v24, %v4806_v40  ;;  %v3325_v29 = vrot.slane %v3318_v25, %v4806_v40  ;;  %v3333_v30 = vrot.slane %v3863_v26, %v4806_v40  ;;  %v3879_v23 = vld [vmem:[#allocation5 + $0x1] ss:$0 sm:$0xff] }
0x117d   : > { %v3335_v31 = vcombine.high %v3309_v27, %v3317_v28  ;;  %v3351_v32 = vcombine.high %v3325_v29, %v3333_v30  ;;  %v3334_v33 = vcombine.low %v3309_v27, %v3317_v28  ;;  %v3350_v34 = vcombine.low %v3325_v29, %v3333_v30  ;;  %v3890_v28 = vld [vmem:[%s5157_s8 + $0x1] ss:$0 sm:$0xff] }
0x117f   : > { %v3349_v35 = vrot.slane %v3335_v31, %v4808_v47  ;;  %v3365_v37 = vrot.slane %v3351_v32, %v4808_v47  ;;  %v3342_v38 = vrot.slane %v3334_v33, %v4808_v47  ;;  %v3358_v39 = vrot.slane %v3350_v34, %v4808_v47  ;;  %v3869_v47 = vld [vmem:[%s5153_s4 + $0x1] ss:$0 sm:$0xff] }
0x1181   : > { %v3368_v41 = vcombine.low %v3349_v35, %v3365_v37  ;;  %v3367_v42 = vcombine.high %v3342_v38, %v3358_v39  ;;  %v3366_v8 = vcombine.low %v3342_v38, %v3358_v39  ;;  %v3369_v40 = vcombine.high %v3349_v35, %v3365_v37 }
0x1183   : > { %3375 = vrot.lane.b32.xlu0 %v3368_v41, %s5202_s21  ;;  %3371 = vrot.lane.b32.xlu1 %v3367_v42, %s5203_s18  ;;  %s5206_s18 = sld [smem:[#allocation17_spill]] }
0x1187   : > { %3379 = vrot.lane.b32.xlu1 %v3369_v40, %s5204_s17  ;;  %s3714_s17 = scalar_lea.sflag [#allocation4], %s4690_s13 }
0x1189   : > { %s5104_s0 = scalar_lea.hbm %s5206_s18, %s3897_s11 }
0x11f5   : > { %v3372_v43 = vpop.permute.xlu1 %3371  ;;  %v3376_v44 = vpop.permute.xlu0 %3375 }
0x11f6   : > { %v3382_v45 = vsel %vm712_vm2, %v3366_v8, %v3372_v43  ;;  %v3894_v43 = vld [vmem:[%s5199_s30 + $0x1] ss:$0 sm:$0xff] }
0x11f7   : > { %v3383_v48 = vsel %vm1766_vm3, %v3382_v45, %v3376_v44  ;;  %v3895_v45 = vld [vmem:[%s5200_s12 + $0x1] ss:$0 sm:$0xff] }
0x11f9   : > { %v3380_v46 = vpop.permute.xlu1 %3379 }
0x11fa   : > { %v3384_v49 = vsel %vm1768_vm4, %v3383_v48, %v3380_v46 }
0x11fb   : > { %4132 = vmatmul.mubr.msk.f32.vlgmr.msra.gmra.mrb[18].mxu1 %vm483_vm1, %v3384_v49 }
0x11fc   : > { %4161 = vmatprep.mubr.msk.f32.mxu1 %vm4471_vm0, %v4472_v1  ;;  %v3875_v1 = vld [vmem:[%s5154_s5 + $0x20] sm:$0xff]  ;;  %4214 = vmatpush3.bf16.msra.mxu1 %v4213_v5 }
0x11fd   : > { %v4207_v61 = vpack.c.bf16 %v3876_v60, %v3875_v1  ;;  %4215 = vmatprep.subr.bf16.mxu1 %v4470_v0 }
0x11ff   : > { %4208 = vmatpush3.bf16.msra.mxu0 %v4207_v61 }
0x1200   : > { %4209 = vmatprep.subr.bf16.mxu0 %v4470_v0  ;;  %4217 = vmatpush3.bf16.msra.mxu1 %v4216_v7 }
0x1201   : > { %4218 = vmatprep.subr.bf16.mxu1 %v4470_v0 }
0x1204   : > { %4220 = vmatpush3.bf16.msra.mxu1 %v4219_v11 }
0x1205   : > { %4221 = vmatprep.subr.bf16.mxu1 %v4470_v0  ;;  %v3887_v0 = vld [vmem:[%s5156_s7 + $0x70] sm:$0xff] }
0x1206   : > { %v4222_v22 = vpack.c.bf16 %v3888_v21, %v3887_v0 }
0x1208   : > { %4223 = vmatpush3.bf16.msra.mxu1 %v4222_v22 }
0x12ce   : > { %v3467_v50 = vpop.f32.mrb[18].mxu1 }
0x12cf   : > { %v3468_v51 = vadd.f32 %v3869_v47, %v3467_v50  ;;  %v4133_v52 = vpop.f32.mrb[19].mxu1 }
0x12d1   : > { %v3471_v53 = vadd.f32 %v3468_v51, %v4927_v36  ;;  %v3877_v36 = vld [vmem:[%s5154_s5 + $0x30] sm:$0xff] }
0x12d2   : > { %v4210_v63 = vpack.c.bf16 %v3878_v62, %v3877_v36 }
0x12d3   : > { %v3476_v54 = vsel %vm483_vm1, %v3471_v53, 0.0 }
0x12d4   : > { %3477 = vadd.xlane.f32.xlu1 %v3476_v54  ;;  %4211 = vmatpush3.bf16.msra.mxu0 %v4210_v63 }
0x1361   : > { %v3478_v55 = vpop.xlane.xlu1 %3477 }
0x1362   : > { %v3479_v56 = vmul.f32 0.03125, %v3478_v55 }
0x1364   : > { %v3480_v57 = vsub.f32 %v3471_v53, %v3479_v56 }
0x1366   : > { %v3481_v58 = vmul.f32 %v3480_v57, %v3480_v57 }
0x1368   : > { %v3482_v59 = vsel %vm483_vm1, %v3481_v58, 0.0 }
0x1369   : > { %3483 = vadd.xlane.f32.xlu0 %v3482_v59 }
0x13f6   : > { %v3484_v12 = vpop.xlane.xlu0 %3483 }
0x13f7   : > { %v3485_v13 = vmul.f32 0.03125, %v3484_v12 }
0x13f9   : > { %v3486_v14 = vadd.f32 1e-05, %v3485_v13 }
0x13fb   : > { %4332 = vrsqrt.f32 %v3486_v14 }
0x1405   : > { %v4333_v15 = vpop.eup %4332 }
0x1406   : > { %v3488_v17 = vmul.f32 %v4333_v15, %v3480_v57 }
0x1408   : > { %v3495_v19 = vmul.f32 %v3873_v16, %v3488_v17 }
0x140a   : > { %v3502_v20 = vadd.f32 %v3874_v18, %v3495_v19 }
0x140c   : > { %4143 = vmatmul.mubr.msk.f32.vlgmr.msra.gmra.mrb[24].mxu0 %vm483_vm1, %v3502_v20 }
0x14df   : > { %v3585_v24 = vpop.f32.mrb[24].mxu0 }
0x14e0   : > { %v3586_v25 = vadd.f32 %v3879_v23, %v3585_v24  ;;  %v4144_v26 = vpop.f32.mrb[25].mxu0 }
0x14e2   : > { %v3589_v27 = vmax.f32 %v3586_v25, 0.0 }
0x14e4   : > { %4162 = vmatmul.mubr.msk.f32.vlgmr.msra.gmra.mrb[20].mxu1 %vm1985_vm5, %v3589_v27 }
0x15b7   : > { %v3676_v29 = vpop.f32.mrb[20].mxu1 }
0x15b8   : > { %v3677_v30 = vadd.f32 %v3890_v28, %v3676_v29  ;;  %v4163_v31 = vpop.f32.mrb[21].mxu1 }
0x15ba   : > { %v3680_v32 = vadd.f32 %v3677_v30, %v3502_v20 }
0x15bc   : > { %v3685_v33 = vsel %vm483_vm1, %v3680_v32, 0.0 }
0x15bd   : > { %3686 = vadd.xlane.f32.xlu1 %v3685_v33 }
0x164a   : > { %v3687_v34 = vpop.xlane.xlu1 %3686 }
0x164b   : > { %v3688_v35 = vmul.f32 0.03125, %v3687_v34 }
0x164d   : > { %v3689_v37 = vsub.f32 %v3680_v32, %v3688_v35 }
0x164f   : > { %v3690_v38 = vmul.f32 %v3689_v37, %v3689_v37 }
0x1651   : > { %v3691_v39 = vsel %vm483_vm1, %v3690_v38, 0.0 }
0x1652   : > { %3692 = vadd.xlane.f32.xlu0 %v3691_v39 }
0x16df   : > { %v3693_v41 = vpop.xlane.xlu0 %3692 }
0x16e0   : > { %v3694_v42 = vmul.f32 0.03125, %v3693_v41 }
0x16e2   : > { %v3695_v8 = vadd.f32 1e-05, %v3694_v42 }
0x16e4   : > { %4334 = vrsqrt.f32 %v3695_v8 }
0x16ee   : > { %v4335_v40 = vpop.eup %4334 }
0x16ef   : > { %v3697_v44 = vmul.f32 %v4335_v40, %v3689_v37 }
0x16f1   : > { %v3704_v46 = vmul.f32 %v3894_v43, %v3697_v44 }
0x16f3   : > { %v3711_v48 = vadd.f32 %v3895_v45, %v3704_v46 }
0x16f5   : > { %3712 = vst.msk [vmem:[%s470_s25] sm:$0xff] %vm483_vm1, %v3711_v48 }
0x16f6   : > { %4407 = shalt.err (!%p4404_p7)
}
0x16f7   : > { %s4408_s13 = scalar_lea.hbm %s5104_s0, 128  ;;  %s4412_s25 = scalar_lea.hbm %s5206_s18, 256 }
0x16f8   : > { %p4409_p9 = scmp.ne.s32.totalorder %s5104_s0, %s4408_s13  ;;  %p4413_p0 = scmp.lt.u32.totalorder %s5104_s0, %s5206_s18 }
0x16f9   : > { %p4414_p11 = scmp.lt.u32.totalorder %s4412_s25, %s4408_s13  ;;  %p4416_p4 = scmp.lt.u32.totalorder %s4408_s13, %s5104_s0 }
0x16fa   : > { %p4410_p2 = pnand %p4409_p9, %p4645_p12 }
0x16fb   : > { %p4415_p1 = por %p4414_p11, %p4413_p0 }
0x16fc   : > { %p4411_p5 = pneg %p4410_p2 }
0x16fd   : > { %p4417_p6 = por %p4416_p4, %p4415_p1 }
0x16ff   : > { %p4418_p8 = pnand %p4417_p6, %p4411_p5 }
0x1701   : > { %4421 = shalt.err (!%p4418_p8)
}
0x1702   : > { %4230 = dma.vmem_to_hbm [thread:$0]  (%p4645_p12), %s5106_s22, 128, %s5104_s0, %s3714_s17  }
0x1703 PF: > { %s5207_s19 = sld [smem:[#allocation11_spill]]  ;;  %s5208_s29 = sld [smem:[#allocation12_spill]] }
0x1704   : > { %p5210_p13 = scmp.ge.s32.totalorder %s4464_s28, 2 }
0x1709   : > { %s3739_s14 = sand.u32 1, %s5207_s19   ;;  %p5209_p10 = scmp.ne.s32.totalorder %s5208_s29, 0 }
0x170a   : > { %s3740_s16 = scalar_lea.sflag [#allocation4], %s3739_s14 }
0x170b   : > { %p4241_p3 = pnand %p5210_p13, %p5209_p10 }
0x170d   : > { %4447 = dma.done.wait (!%p4241_p3), %s3740_s16, 128  }
0x170e   : > { %4449 = vsyncadd (!%p4241_p3), %s3740_s16, 4294967168  ;;  %s5211_s28 = sld [smem:[#allocation13_spill]]  ;;  %s5212_s25 = smov %s4456_s26 }
0x170f   : > { %s5213_s26 = smov %s4460_s27  ;;  %s5214_s27 = smov %s4641_s20 }
0x1714   : > { %p27_p7 = scmp.ge.s32.totalorder %s5211_s28, 4  }
0x1716   :  { %29 = sbr.rel (!%p27_p7) target bundleno = 11 (0xb), region = 133 }
0x171d   :  { %3745 = vsyncpa [#allocation3], 1 }
0x171e   :  { %3747 = vsyncpa [#allocation3 + $0x1], 1 }
0x171f   :  { %3748 = vsyncpa [#allocation6], 1 }
0x1720   :  { %3749 = vsyncpa [#allocation4], 1 }
0x1721   :  { %3751 = vsyncpa [#allocation4 + $0x1], 1 }

</bundles_post_ra>
